<compile_context>
chip_gen: v6e
topology: v6e:2x2x1
jax: 0.10.0
libtpu: 0.0.40
codegen_flags: <defaults>
</compile_context>

<pallas_src>
import functools

import jax
import jax.numpy as jnp
from jax.experimental import pallas as pl
from jax.experimental.pallas import tpu as pltpu

HIDDEN = 1024
_MAX_BATCH_TILE = 256  # rows per grid step once the batch is large


# ---------------------------------------------------------------------------
# Kernels. Weights arrive pre-transposed to (in, out) (bf16), biases as (1, out)
# (f32). Activations are cast to the weight dtype only as MXU inputs; the
# accumulation and the bias+ReLU epilogue stay in f32.
# ---------------------------------------------------------------------------
def _linear_relu(x_f32, w_ref, b_ref):
    y = jnp.dot(x_f32.astype(w_ref.dtype), w_ref[...],
                preferred_element_type=jnp.float32)
    return jnp.maximum(y + b_ref[...].astype(jnp.float32), 0.0)


def _ae_train_kernel(x_ref, w1_ref, b1_ref, w2_ref, b2_ref,
                     w3_ref, b3_ref, w4_ref, b4_ref, recon_ref, code_ref):
    """Fused 4-layer forward; writes reconstruction AND code in one dispatch."""
    x = x_ref[...].astype(jnp.float32)
    h = _linear_relu(x, w1_ref, b1_ref)       # encoder hidden
    c = _linear_relu(h, w2_ref, b2_ref)       # encoder output (code)
    code_ref[...] = c.astype(code_ref.dtype)
    h = _linear_relu(c, w3_ref, b3_ref)       # decoder hidden
    r = _linear_relu(h, w4_ref, b4_ref)       # decoder output
    recon_ref[...] = r.astype(recon_ref.dtype)


def _ae_encode_kernel(x_ref, w1_ref, b1_ref, w2_ref, b2_ref, code_ref):
    """Fused 2-layer encoder forward (train=False path)."""
    x = x_ref[...].astype(jnp.float32)
    h = _linear_relu(x, w1_ref, b1_ref)
    c = _linear_relu(h, w2_ref, b2_ref)
    code_ref[...] = c.astype(code_ref.dtype)


# ---------------------------------------------------------------------------
# pallas_call wrappers: batch-tiled grid, weights VMEM-resident.
# ---------------------------------------------------------------------------
def _round_up(x, m):
    return (x + m - 1) // m * m


def _batch_tile(batch):
    return min(_round_up(batch, 8), _MAX_BATCH_TILE)


def _pad_batch(x, bm):
    b = x.shape[0]
    bp = _round_up(b, bm)
    if bp != b:
        x = jnp.pad(x, ((0, bp - b), (0, 0)))
    return x, bp


def _row_spec(bm, d):
    return pl.BlockSpec((bm, d), lambda i: (i, 0))


def _resident_spec(shape):
    # Constant index_map -> block index never changes -> no re-DMA across steps.
    return pl.BlockSpec(shape, lambda i: (0, 0))


def _ae_train_call(x, params):
    w1, b1, w2, b2, w3, b3, w4, b4 = params
    batch, d_in = x.shape
    d_code = w2.shape[1]
    bm = _batch_tile(batch)
    xp, bp = _pad_batch(x, bm)
    recon, code = pl.pallas_call(
        _ae_train_kernel,
        out_shape=(jax.ShapeDtypeStruct((bp, d_in), x.dtype),
                   jax.ShapeDtypeStruct((bp, d_code), x.dtype)),
        grid=(bp // bm,),
        in_specs=[_row_spec(bm, d_in),
                  _resident_spec(w1.shape), _resident_spec(b1.shape),
                  _resident_spec(w2.shape), _resident_spec(b2.shape),
                  _resident_spec(w3.shape), _resident_spec(b3.shape),
                  _resident_spec(w4.shape), _resident_spec(b4.shape)],
        out_specs=(_row_spec(bm, d_in), _row_spec(bm, d_code)),
        compiler_params=pltpu.CompilerParams(
            dimension_semantics=("parallel",)),
    )(xp, w1, b1, w2, b2, w3, b3, w4, b4)
    return recon[:batch], code[:batch]


def _ae_encode_call(x, params):
    w1, b1, w2, b2 = params[:4]
    batch, d_in = x.shape
    d_code = w2.shape[1]
    bm = _batch_tile(batch)
    xp, bp = _pad_batch(x, bm)
    code = pl.pallas_call(
        _ae_encode_kernel,
        out_shape=jax.ShapeDtypeStruct((bp, d_code), x.dtype),
        grid=(bp // bm,),
        in_specs=[_row_spec(bm, d_in),
                  _resident_spec(w1.shape), _resident_spec(b1.shape),
                  _resident_spec(w2.shape), _resident_spec(b2.shape)],
        out_specs=_row_spec(bm, d_code),
        compiler_params=pltpu.CompilerParams(
            dimension_semantics=("parallel",)),
    )(xp, w1, b1, w2, b2)
    return code[:batch]


# ---------------------------------------------------------------------------
# Parameter init (PyTorch nn.Linear layout/init) + one-time prepare step.
# ---------------------------------------------------------------------------
def init_ae_params(key, input_shape, output_shape, hidden=HIDDEN,
                   dtype=jnp.float32):
    """PyTorch-style params: list of (weight(out,in), bias(out,)) per layer."""
    dims = [
        (hidden, input_shape),    # encoder_hidden_layer
        (output_shape, hidden),   # encoder_output_layer
        (hidden, output_shape),   # decoder_hidden_layer
        (input_shape, hidden),    # decoder_output_layer
    ]
    params = []
    for out_f, in_f in dims:
        key, kw, kb = jax.random.split(key, 3)
        bound = 1.0 / jnp.sqrt(in_f)
        w = jax.random.uniform(kw, (out_f, in_f), dtype, -bound, bound)
        b = jax.random.uniform(kb, (out_f,), dtype, -bound, bound)
        params.append((w, b))
    return params


def prepare_ae_params(torch_layout_params, weights_dtype=jnp.bfloat16):
    """One-time layout/dtype prep (do this OUTSIDE the per-step forward):
    weights -> (in, out) in `weights_dtype`, biases -> (1, out) f32."""
    flat = []
    for w, b in torch_layout_params:
        flat.append(jnp.asarray(w.T, dtype=weights_dtype))
        flat.append(jnp.asarray(b, dtype=jnp.float32).reshape(1, -1))
    return tuple(flat)


# ---------------------------------------------------------------------------
# Jitted forwards.
# ---------------------------------------------------------------------------
@functools.partial(jax.jit, static_argnames=("train",))
def ae_forward(features, prepared_params, train=True):
    """Matches AE.forward: ReLU after every layer (including the final one)."""
    if train:
        recon, _ = _ae_train_call(features, prepared_params)
        return recon
    return _ae_encode_call(features, prepared_params)


@jax.jit
def ae_forward_with_code(features, prepared_params):
    """Single dispatch returning (reconstruction, code) for training loops
    that consume both."""
    return _ae_train_call(features, prepared_params)


# ---------------------------------------------------------------------------
# References for correctness checks.
# ---------------------------------------------------------------------------
def _reference_from_prepared(features, prepared, train=True):
    """Mirrors the kernel math exactly (bf16 MXU inputs, f32 accum/epilogue)."""
    w1, b1, w2, b2, w3, b3, w4, b4 = prepared

    def lr(x, w, b):
        y = jnp.dot(x.astype(w.dtype), w, preferred_element_type=jnp.float32)
        return jnp.maximum(y + b.astype(jnp.float32), 0.0)

    x = features.astype(jnp.float32)
    h = lr(x, w1, b1)
    c = lr(h, w2, b2)
    if not train:
        return c
    h = lr(c, w3, b3)
    return lr(h, w4, b4)


def _reference_forward_f32(features, torch_layout_params, train=True):
    (w1, b1), (w2, b2), (w3, b3), (w4, b4) = torch_layout_params
    a = jnp.maximum(features @ w1.T + b1, 0.0)
    c = jnp.maximum(a @ w2.T + b2, 0.0)
    if not train:
        return c
    a = jnp.maximum(c @ w3.T + b3, 0.0)
    return jnp.maximum(a @ w4.T + b4, 0.0)


if __name__ == "__main__":
    key = jax.random.PRNGKey(0)
    batch = 8            # NOTE: cost per call is flat until batch ~ MXU height;
    input_shape = 256    # pack more rows per dispatch for free throughput.
    output_shape = 128

    kx, kp = jax.random.split(key)
    features = jax.random.normal(kx, (batch, input_shape), jnp.float32)
    torch_params = init_ae_params(kp, input_shape, output_shape)
    params = prepare_ae_params(torch_params, weights_dtype=jnp.bfloat16)

    recon = ae_forward(features, params, train=True)
    code = ae_forward(features, params, train=False)
    recon2, code2 = ae_forward_with_code(features, params)
    jax.block_until_ready((recon, code, recon2, code2))

    assert recon.shape == (batch, input_shape)
    assert code.shape == (batch, output_shape)

    # Tight check against a reference that mirrors the kernel's bf16/f32 math.
    ref_recon = _reference_from_prepared(features, params, train=True)
    ref_code = _reference_from_prepared(features, params, train=False)
    assert jnp.allclose(recon, ref_recon, atol=1e-3, rtol=1e-3)
    assert jnp.allclose(code, ref_code, atol=1e-3, rtol=1e-3)
    assert jnp.allclose(recon2, ref_recon, atol=1e-3, rtol=1e-3)
    assert jnp.allclose(code2, ref_code, atol=1e-3, rtol=1e-3)

    # Loose sanity check against the full-f32 PyTorch-layout reference
    # (bf16 weights introduce ~1% relative error).
    f32_recon = _reference_forward_f32(features, torch_params, train=True)
    f32_code = _reference_forward_f32(features, torch_params, train=False)
    assert jnp.allclose(recon, f32_recon, atol=5e-2, rtol=5e-2)
    assert jnp.allclose(code, f32_code, atol=5e-2, rtol=5e-2)

    print("KERNEL_OK")
</pallas_src>

<mosaic_0001>
module attributes {stable_mosaic.version = 11 : i64} {
  func.func @_ae_train_kernel(%arg0: i32, %arg1: memref<8x256xf32, #tpu.memory_space<vmem>>, %arg2: memref<256x1024xbf16, #tpu.memory_space<vmem>>, %arg3: memref<1x1024xf32, #tpu.memory_space<vmem>>, %arg4: memref<1024x128xbf16, #tpu.memory_space<vmem>>, %arg5: memref<1x128xf32, #tpu.memory_space<vmem>>, %arg6: memref<128x1024xbf16, #tpu.memory_space<vmem>>, %arg7: memref<1x1024xf32, #tpu.memory_space<vmem>>, %arg8: memref<1024x256xbf16, #tpu.memory_space<vmem>>, %arg9: memref<1x256xf32, #tpu.memory_space<vmem>>, %arg10: memref<8x256xf32, #tpu.memory_space<vmem>>, %arg11: memref<8x128xf32, #tpu.memory_space<vmem>>) attributes {dimension_semantics = [#tpu.dimension_semantics<parallel>], iteration_bounds = array<i64: 1>, scalar_prefetch = 0 : i64, scratch_operands = 0 : i64, tpu.core_type = #tpu.core_type<tc>, window_params = [{transform_indices = @transform_0, window_bounds = array<i64: 8, 256>}, {pipeline_mode = #tpu.pipeline_mode<synchronous>, transform_indices = @transform_1, window_bounds = array<i64: 256, 1024>}, {pipeline_mode = #tpu.pipeline_mode<synchronous>, transform_indices = @transform_2, window_bounds = array<i64: 1, 1024>}, {pipeline_mode = #tpu.pipeline_mode<synchronous>, transform_indices = @transform_3, window_bounds = array<i64: 1024, 128>}, {pipeline_mode = #tpu.pipeline_mode<synchronous>, transform_indices = @transform_4, window_bounds = array<i64: 1, 128>}, {pipeline_mode = #tpu.pipeline_mode<synchronous>, transform_indices = @transform_5, window_bounds = array<i64: 128, 1024>}, {pipeline_mode = #tpu.pipeline_mode<synchronous>, transform_indices = @transform_6, window_bounds = array<i64: 1, 1024>}, {pipeline_mode = #tpu.pipeline_mode<synchronous>, transform_indices = @transform_7, window_bounds = array<i64: 1024, 256>}, {pipeline_mode = #tpu.pipeline_mode<synchronous>, transform_indices = @transform_8, window_bounds = array<i64: 1, 256>}, {transform_indices = @transform_9, window_bounds = array<i64: 8, 256>}, {transform_indices = @transform_10, window_bounds = array<i64: 8, 128>}]} {
    %c0 = arith.constant 0 : index
    %c0_0 = arith.constant 0 : index
    %0 = vector.load %arg1[%c0, %c0_0] : memref<8x256xf32, #tpu.memory_space<vmem>>, vector<8x256xf32>
    %1 = arith.truncf %0 : vector<8x256xf32> to vector<8x256xbf16>
    %c0_1 = arith.constant 0 : index
    %c0_2 = arith.constant 0 : index
    %2 = vector.load %arg2[%c0_1, %c0_2] : memref<256x1024xbf16, #tpu.memory_space<vmem>>, vector<256x1024xbf16>
    %cst = arith.constant dense<0.000000e+00> : vector<8x1024xf32>
    %3 = tpu.matmul %1, %2, %cst {dimension_numbers = #tpu.dot_dimension_numbers<[1], [0], [0], [1], [0, 0, 1, 1], [], []>} : vector<8x256xbf16>, vector<256x1024xbf16>, vector<8x1024xf32> -> vector<8x1024xf32>
    %c0_3 = arith.constant 0 : index
    %c0_4 = arith.constant 0 : index
    %4 = vector.load %arg3[%c0_3, %c0_4] : memref<1x1024xf32, #tpu.memory_space<vmem>>, vector<1x1024xf32>
    %5 = vector.broadcast %4 : vector<1x1024xf32> to vector<8x1024xf32>
    %6 = arith.addf %3, %5 : vector<8x1024xf32>
    %cst_5 = arith.constant 0.000000e+00 : f32
    %7 = vector.broadcast %cst_5 : f32 to vector<8x1024xf32>
    %8 = arith.maximumf %6, %7 : vector<8x1024xf32>
    %9 = arith.truncf %8 : vector<8x1024xf32> to vector<8x1024xbf16>
    %c0_6 = arith.constant 0 : index
    %c0_7 = arith.constant 0 : index
    %10 = vector.load %arg4[%c0_6, %c0_7] : memref<1024x128xbf16, #tpu.memory_space<vmem>>, vector<1024x128xbf16>
    %cst_8 = arith.constant dense<0.000000e+00> : vector<8x128xf32>
    %11 = tpu.matmul %9, %10, %cst_8 {dimension_numbers = #tpu.dot_dimension_numbers<[1], [0], [0], [1], [0, 0, 1, 1], [], []>} : vector<8x1024xbf16>, vector<1024x128xbf16>, vector<8x128xf32> -> vector<8x128xf32>
    %c0_9 = arith.constant 0 : index
    %c0_10 = arith.constant 0 : index
    %12 = vector.load %arg5[%c0_9, %c0_10] : memref<1x128xf32, #tpu.memory_space<vmem>>, vector<1x128xf32>
    %13 = vector.broadcast %12 : vector<1x128xf32> to vector<8x128xf32>
    %14 = arith.addf %11, %13 : vector<8x128xf32>
    %cst_11 = arith.constant 0.000000e+00 : f32
    %15 = vector.broadcast %cst_11 : f32 to vector<8x128xf32>
    %16 = arith.maximumf %14, %15 : vector<8x128xf32>
    %c0_12 = arith.constant 0 : index
    %c0_13 = arith.constant 0 : index
    %17 = vector.load %arg11[%c0_12, %c0_13] : memref<8x128xf32, #tpu.memory_space<vmem>>, vector<8x128xf32>
    tpu.vector_store %arg11[%c0_12, %c0_13], %16 {strides = array<i32>} : memref<8x128xf32, #tpu.memory_space<vmem>>, vector<8x128xf32>,
    %18 = arith.truncf %16 : vector<8x128xf32> to vector<8x128xbf16>
    %c0_14 = arith.constant 0 : index
    %c0_15 = arith.constant 0 : index
    %19 = vector.load %arg6[%c0_14, %c0_15] : memref<128x1024xbf16, #tpu.memory_space<vmem>>, vector<128x1024xbf16>
    %cst_16 = arith.constant dense<0.000000e+00> : vector<8x1024xf32>
    %20 = tpu.matmul %18, %19, %cst_16 {dimension_numbers = #tpu.dot_dimension_numbers<[1], [0], [0], [1], [0, 0, 1, 1], [], []>} : vector<8x128xbf16>, vector<128x1024xbf16>, vector<8x1024xf32> -> vector<8x1024xf32>
    %c0_17 = arith.constant 0 : index
    %c0_18 = arith.constant 0 : index
    %21 = vector.load %arg7[%c0_17, %c0_18] : memref<1x1024xf32, #tpu.memory_space<vmem>>, vector<1x1024xf32>
    %22 = vector.broadcast %21 : vector<1x1024xf32> to vector<8x1024xf32>
    %23 = arith.addf %20, %22 : vector<8x1024xf32>
    %cst_19 = arith.constant 0.000000e+00 : f32
    %24 = vector.broadcast %cst_19 : f32 to vector<8x1024xf32>
    %25 = arith.maximumf %23, %24 : vector<8x1024xf32>
    %26 = arith.truncf %25 : vector<8x1024xf32> to vector<8x1024xbf16>
    %c0_20 = arith.constant 0 : index
    %c0_21 = arith.constant 0 : index
    %27 = vector.load %arg8[%c0_20, %c0_21] : memref<1024x256xbf16, #tpu.memory_space<vmem>>, vector<1024x256xbf16>
    %cst_22 = arith.constant dense<0.000000e+00> : vector<8x256xf32>
    %28 = tpu.matmul %26, %27, %cst_22 {dimension_numbers = #tpu.dot_dimension_numbers<[1], [0], [0], [1], [0, 0, 1, 1], [], []>} : vector<8x1024xbf16>, vector<1024x256xbf16>, vector<8x256xf32> -> vector<8x256xf32>
    %c0_23 = arith.constant 0 : index
    %c0_24 = arith.constant 0 : index
    %29 = vector.load %arg9[%c0_23, %c0_24] : memref<1x256xf32, #tpu.memory_space<vmem>>, vector<1x256xf32>
    %30 = vector.broadcast %29 : vector<1x256xf32> to vector<8x256xf32>
    %31 = arith.addf %28, %30 : vector<8x256xf32>
    %cst_25 = arith.constant 0.000000e+00 : f32
    %32 = vector.broadcast %cst_25 : f32 to vector<8x256xf32>
    %33 = arith.maximumf %31, %32 : vector<8x256xf32>
    %c0_26 = arith.constant 0 : index
    %c0_27 = arith.constant 0 : index
    %34 = vector.load %arg10[%c0_26, %c0_27] : memref<8x256xf32, #tpu.memory_space<vmem>>, vector<8x256xf32>
    tpu.vector_store %arg10[%c0_26, %c0_27], %33 {strides = array<i32>} : memref<8x256xf32, #tpu.memory_space<vmem>>, vector<8x256xf32>,
    return
  }
  func.func @transform_0(%arg0: i32) -> (i32, i32) {
    %c0_i32 = arith.constant 0 : i32
    %c0_i32_0 = arith.constant 0 : i32
    return %arg0, %c0_i32 : i32, i32
  }
  func.func @transform_1(%arg0: i32) -> (i32, i32) {
    %c0_i32 = arith.constant 0 : i32
    %c0_i32_0 = arith.constant 0 : i32
    %c0_i32_1 = arith.constant 0 : i32
    return %c0_i32, %c0_i32_0 : i32, i32
  }
  func.func @transform_2(%arg0: i32) -> (i32, i32) {
    %c0_i32 = arith.constant 0 : i32
    %c0_i32_0 = arith.constant 0 : i32
    %c0_i32_1 = arith.constant 0 : i32
    return %c0_i32, %c0_i32_0 : i32, i32
  }
  func.func @transform_3(%arg0: i32) -> (i32, i32) {
    %c0_i32 = arith.constant 0 : i32
    %c0_i32_0 = arith.constant 0 : i32
    %c0_i32_1 = arith.constant 0 : i32
    return %c0_i32, %c0_i32_0 : i32, i32
  }
  func.func @transform_4(%arg0: i32) -> (i32, i32) {
    %c0_i32 = arith.constant 0 : i32
    %c0_i32_0 = arith.constant 0 : i32
    %c0_i32_1 = arith.constant 0 : i32
    return %c0_i32, %c0_i32_0 : i32, i32
  }
  func.func @transform_5(%arg0: i32) -> (i32, i32) {
    %c0_i32 = arith.constant 0 : i32
    %c0_i32_0 = arith.constant 0 : i32
    %c0_i32_1 = arith.constant 0 : i32
    return %c0_i32, %c0_i32_0 : i32, i32
  }
  func.func @transform_6(%arg0: i32) -> (i32, i32) {
    %c0_i32 = arith.constant 0 : i32
    %c0_i32_0 = arith.constant 0 : i32
    %c0_i32_1 = arith.constant 0 : i32
    return %c0_i32, %c0_i32_0 : i32, i32
  }
  func.func @transform_7(%arg0: i32) -> (i32, i32) {
    %c0_i32 = arith.constant 0 : i32
    %c0_i32_0 = arith.constant 0 : i32
    %c0_i32_1 = arith.constant 0 : i32
    return %c0_i32, %c0_i32_0 : i32, i32
  }
  func.func @transform_8(%arg0: i32) -> (i32, i32) {
    %c0_i32 = arith.constant 0 : i32
    %c0_i32_0 = arith.constant 0 : i32
    %c0_i32_1 = arith.constant 0 : i32
    return %c0_i32, %c0_i32_0 : i32, i32
  }
  func.func @transform_9(%arg0: i32) -> (i32, i32) {
    %c0_i32 = arith.constant 0 : i32
    %c0_i32_0 = arith.constant 0 : i32
    return %arg0, %c0_i32 : i32, i32
  }
  func.func @transform_10(%arg0: i32) -> (i32, i32) {
    %c0_i32 = arith.constant 0 : i32
    %c0_i32_0 = arith.constant 0 : i32
    return %arg0, %c0_i32 : i32, i32
  }
}

</mosaic_0001>

<bundles_post_ra>
// kernel: ae_forward.1
= control target key start
LH: loop header
LB: loop body
LE: loop exit
PB: predicated region body
PF: predicated region fallthrough
CT: control target
= control target key end

     0   :  { %16 = vsyncpa [#allocation3], 0  ;;  %s4523_s0 = inlined_call_operand.hbm [shape: f32[8,256], index: 0, kind: input, shape index: {}]   ;;  %s4524_s1 = inlined_call_operand.hbm [shape: bf16[256,1024], index: 1, kind: input, shape index: {}]   ;;  %s4525_s2 = inlined_call_operand.hbm [shape: f32[1,1024], index: 2, kind: input, shape index: {}]   ;;  %s4526_s3 = inlined_call_operand.hbm [shape: bf16[1024,128], index: 3, kind: input, shape index: {}]   ;;  %s4527_s4 = inlined_call_operand.hbm [shape: f32[1,128], index: 4, kind: input, shape index: {}]   ;;  %s4528_s5 = inlined_call_operand.hbm [shape: bf16[128,1024], index: 5, kind: input, shape index: {}]   ;;  %s4529_s6 = inlined_call_operand.vmem [shape: f32[1,1024], index: 6, kind: input, shape index: {}]   ;;  %s4530_s7 = inlined_call_operand.hbm [shape: bf16[1024,256], index: 7, kind: input, shape index: {}]   ;;  %s4531_s8 = inlined_call_operand.vmem [shape: f32[1,256], index: 8, kind: input, shape index: {}]   ;;  %s4532_s9 = inlined_call_operand.hbm [shape: f32[8,256], index: 9, kind: output, shape index: {0}]   ;;  %s4533_s10 = inlined_call_operand.hbm [shape: f32[8,128], index: 10, kind: output, shape index: {1}]  }
   0x1   :  { %17 = vsyncpa [#allocation6], 0 }
   0x2   :  { %18 = vsyncpa [#allocation9], 0 }
   0x3   :  { %19 = vsyncpa [#allocation12], 0 }
   0x4   :  { %20 = vsyncpa [#allocation4], 0 }
   0x5   :  { %21 = vsyncpa [#allocation16], 0  ;;  %s4325_s13 = smov [#allocation5]  }
   0x6   :  { %s37_s14 = sshll.u32 %s4325_s13, 4  ;;  %s38_s14 = int_to_ptr.vmem [resolvable:$true] %s37_s14 }
   0x7   :  { %s4141_s15 = scalar_lea.vmem %s38_s14, 16384  ;;  %p4146_p1 = scmp.lt.s32.totalorder %s38_s14, %s38_s14 }
   0x8   :  { %p4142_p0 = scmp.ne.s32.totalorder %s38_s14, %s4141_s15  ;;  %p4147_p2 = scmp.lt.s32.totalorder %s4141_s15, %s4141_s15 }
   0xa   :  { %p4148_p3 = por %p4147_p2, %p4146_p1 }
   0xc   :  { %p4149_p4 = pnand %p4148_p3, %p4142_p0 }
   0xe   :  { %4152 = shalt.err (!%p4149_p4)
}
   0xf   :  { %s4326_s16 = smov 512   ;;  %s4327_s17 = smov 32  }
  0x10   :  { %43 = dma.hbm_to_vmem [thread:$0]  %s4524_s1, 16384, %s38_s14, [#allocation6], %s4326_s16, %s4326_s16, %s4327_s17  }
  0x11   :  { %s4328_s20 = smov [#allocation8]  }
  0x12   :  { %s59_s21 = sshll.u32 %s4328_s20, 4  ;;  %s60_s21 = int_to_ptr.vmem [resolvable:$true] %s59_s21 }
  0x13   :  { %s4161_s22 = scalar_lea.vmem %s60_s21, 8192  ;;  %p4166_p6 = scmp.lt.s32.totalorder %s60_s21, %s60_s21 }
  0x14   :  { %p4162_p5 = scmp.ne.s32.totalorder %s60_s21, %s4161_s22  ;;  %p4167_p7 = scmp.lt.s32.totalorder %s4161_s22, %s4161_s22 }
  0x16   :  { %p4168_p8 = por %p4167_p7, %p4166_p6 }
  0x18   :  { %p4169_p9 = pnand %p4168_p8, %p4162_p5 }
  0x1a   :  { %4172 = shalt.err (!%p4169_p9)
}
  0x1b   :  { %s4329_s23 = smov 64   ;;  %s4330_s24 = smov 4  }
  0x1c   :  { %65 = dma.hbm_to_vmem [thread:$0]  %s4526_s3, 8192, %s60_s21, [#allocation9], %s4329_s23, %s4329_s23, %s4330_s24  }
  0x1d   :  { %s4331_s27 = smov [#allocation11]   ;;  %s4332_s29 = smov [#allocation2]  }
  0x1e   :  { %s81_s28 = sshll.u32 %s4331_s27, 4  ;;  %s28_s1 = sshll.u32 %s4332_s29, 4  ;;  %s82_s28 = int_to_ptr.vmem [resolvable:$true] %s81_s28  ;;  %s29_s1 = int_to_ptr.vmem [resolvable:$true] %s28_s1 }
  0x1f   :  { %s4181_s30 = scalar_lea.vmem %s82_s28, 8192  ;;  %p4186_p11 = scmp.lt.s32.totalorder %s82_s28, %s82_s28 }
  0x20   :  { %p4182_p10 = scmp.ne.s32.totalorder %s82_s28, %s4181_s30  ;;  %p4187_p12 = scmp.lt.s32.totalorder %s4181_s30, %s4181_s30 }
  0x22   :  { %p4188_p13 = por %p4187_p12, %p4186_p11 }
  0x24   :  { %p4189_p0 = pnand %p4188_p13, %p4182_p10 }
  0x26   :  { %4192 = shalt.err (!%p4189_p0)
}
  0x27   :  { %87 = dma.hbm_to_vmem [thread:$0]  %s4528_s5, 8192, %s82_s28, [#allocation12], %s4326_s16, %s4326_s16, %s4327_s17  }
  0x28   :  { %s4201_s3 = scalar_lea.vmem %s29_s1, 256  ;;  %p4206_p2 = scmp.lt.s32.totalorder %s29_s1, %s29_s1 }
  0x29   :  { %p4202_p1 = scmp.ne.s32.totalorder %s29_s1, %s4201_s3  ;;  %p4207_p3 = scmp.lt.s32.totalorder %s4201_s3, %s4201_s3 }
  0x2b   :  { %p4208_p4 = por %p4207_p3, %p4206_p2 }
  0x2d   :  { %p4209_p5 = pnand %p4208_p4, %p4202_p1 }
  0x2f   :  { %4212 = shalt.err (!%p4209_p5)
}
  0x30   :  { %31 = dma.hbm_to_vmem [thread:$0]  %s4523_s0, 256, %s29_s1, [#allocation3]  }
  0x31   :  { %s4333_s15 = smov [#allocation7]   ;;  %s4334_s19 = smov [#allocation10]  }
  0x32   :  { %s50_s18 = sshll.u32 %s4333_s15, 4  ;;  %s72_s20 = sshll.u32 %s4334_s19, 4  ;;  %s51_s18 = int_to_ptr.vmem [resolvable:$true] %s50_s18  ;;  %s73_s20 = int_to_ptr.vmem [resolvable:$true] %s72_s20 }
  0x33   :  { %s4221_s21 = scalar_lea.vmem %s51_s18, 128  ;;  %p4226_p7 = scmp.lt.s32.totalorder %s51_s18, %s51_s18 }
  0x34   :  { %p4222_p6 = scmp.ne.s32.totalorder %s51_s18, %s4221_s21  ;;  %p4227_p8 = scmp.lt.s32.totalorder %s4221_s21, %s4221_s21 }
  0x36   :  { %p4228_p9 = por %p4227_p8, %p4226_p7 }
  0x38   :  { %p4229_p10 = pnand %p4228_p9, %p4222_p6 }
  0x3a   :  { %4232 = shalt.err (!%p4229_p10)
}
  0x3b   :  { %53 = dma.hbm_to_vmem [thread:$0]  %s4525_s2, 128, %s51_s18, [#allocation6]  }
  0x3c   :  { %s4241_s17 = scalar_lea.vmem %s73_s20, 16  ;;  %s4245_s0 = scalar_lea.vmem %s73_s20, 32 }
  0x3d   :  { %p4242_p11 = scmp.ne.s32.totalorder %s73_s20, %s4241_s17  ;;  %p4246_p12 = scmp.lt.s32.totalorder %s73_s20, %s73_s20 }
  0x3e   :  { %p4247_p13 = scmp.lt.s32.totalorder %s4245_s0, %s4241_s17 }
  0x40   :  { %p4248_p0 = por %p4247_p13, %p4246_p12 }
  0x42   :  { %p4249_p1 = pnand %p4248_p0, %p4242_p11 }
  0x44   :  { %4252 = shalt.err (!%p4249_p1)
}
  0x45   :  { %75 = dma.hbm_to_vmem [thread:$0]  %s4527_s4, 16, %s73_s20, [#allocation9]  }
  0x46   :  { %s4335_s24 = smov [#allocation13]  }
  0x47   :  { %s95_s25 = sshll.u32 %s4335_s24, 4  ;;  %s96_s25 = int_to_ptr.vmem [resolvable:$true] %s95_s25 }
  0x48   :  { %s4261_s26 = scalar_lea.vmem %s96_s25, 16384  ;;  %p4266_p3 = scmp.lt.s32.totalorder %s96_s25, %s96_s25 }
  0x49   :  { %p4262_p2 = scmp.ne.s32.totalorder %s96_s25, %s4261_s26  ;;  %p4267_p4 = scmp.lt.s32.totalorder %s4261_s26, %s4261_s26 }
  0x4b   :  { %p4268_p5 = por %p4267_p4, %p4266_p3 }
  0x4d   :  { %p4269_p6 = pnand %p4268_p5, %p4262_p2 }
  0x4f   :  { %4272 = shalt.err (!%p4269_p6)
}
  0x50   :  { %s4336_s2 = smov 128   ;;  %s4337_s27 = smov 8  }
  0x51   :  { %101 = dma.hbm_to_vmem [thread:$0]  %s4530_s7, 16384, %s96_s25, [#allocation12], %s4336_s2, %s4336_s2, %s4337_s27  }
  0x52   :  { %4313 = dma.done.wait [#allocation3], 256  }
  0x53   :  { %4314 = vsyncadd [#allocation3], 4294967040 }
  0x54   :  { %4315 = dma.done.wait [#allocation6], 16512  }
  0x55   :  { %4316 = vsyncadd [#allocation6], 4294950784 }
  0x56   :  { %4317 = dma.done.wait [#allocation9], 8208  }
  0x57   :  { %4318 = vsyncadd [#allocation9], 4294959088 }
  0x58   :  { %4319 = dma.done.wait [#allocation12], 24576  }
  0x59   :  { %4320 = vsyncadd [#allocation12], 4294942720  ;;  %v186_v0 = vld [vmem:[#allocation5 + $0x1c0] sm:$0xff]  ;;  %v187_v2 = vld [vmem:[#allocation5 + $0x1c8] sm:$0xff] }
  0x5a   :  { %v190_v1 = vld [vmem:[#allocation5 + $0x1e0] sm:$0xff]  ;;  %v191_v4 = vld [vmem:[#allocation5 + $0x1e8] sm:$0xff]  ;;  %v127_v53 = vld [vmem:[#allocation2 + $0x8] sm:$0xff] }
  0x5b   :  { %v3445_v3 = vcombine.high %v186_v0, %v190_v1  ;;  %v3444_v5 = vcombine.low %v186_v0, %v190_v1  ;;  %v178_v6 = vld [vmem:[#allocation5 + $0x180] sm:$0xff]  ;;  %v3447_v8 = vcombine.high %v187_v2, %v191_v4  ;;  %v3446_v9 = vcombine.low %v187_v2, %v191_v4  ;;  %v179_v11 = vld [vmem:[#allocation5 + $0x188] sm:$0xff] }
  0x5c   :  { %v182_v7 = vld [vmem:[#allocation5 + $0x1a0] sm:$0xff]  ;;  %v183_v12 = vld [vmem:[#allocation5 + $0x1a8] sm:$0xff]  ;;  %v4423_v57 = vpack.c.bf16 %v127_v53, %v127_v53 }
  0x5d   :  { %v3437_v10 = vcombine.high %v178_v6, %v182_v7  ;;  %v170_v13 = vld [vmem:[#allocation5 + $0x140] sm:$0xff]  ;;  %940 = vmatprep.subr.bf16.mxu0 %v3445_v3  ;;  %v3439_v14 = vcombine.high %v179_v11, %v183_v12  ;;  %v171_v16 = vld [vmem:[#allocation5 + $0x148] sm:$0xff]  ;;  %981 = vmatprep.subr.bf16.mxu1 %v3447_v8  ;;  %v3436_v18 = vcombine.low %v178_v6, %v182_v7 }
  0x5e   :  { %v174_v15 = vld [vmem:[#allocation5 + $0x160] sm:$0xff]  ;;  %v175_v17 = vld [vmem:[#allocation5 + $0x168] sm:$0xff]  ;;  %941 = vmatpush1.bf16.msra.mxu0 %v3444_v5  ;;  %982 = vmatpush1.bf16.msra.mxu1 %v3446_v9  ;;  %v3438_v19 = vcombine.low %v179_v11, %v183_v12 }
  0x5f   :  { %942 = vmatprep.subr.bf16.mxu0 %v3437_v10  ;;  %v3429_v20 = vcombine.high %v170_v13, %v174_v15  ;;  %983 = vmatprep.subr.bf16.mxu1 %v3439_v14  ;;  %v3431_v21 = vcombine.high %v171_v16, %v175_v17  ;;  %v162_v22 = vld [vmem:[#allocation5 + $0x100] sm:$0xff]  ;;  %v163_v24 = vld [vmem:[#allocation5 + $0x108] sm:$0xff]  ;;  %v3428_v26 = vcombine.low %v170_v13, %v174_v15 }
  0x60   :  { %v166_v23 = vld [vmem:[#allocation5 + $0x120] sm:$0xff]  ;;  %v167_v25 = vld [vmem:[#allocation5 + $0x128] sm:$0xff]  ;;  %v3430_v27 = vcombine.low %v171_v16, %v175_v17  ;;  %972 = vmatprep.mubr.bf16.mxu0 %v4423_v57  ;;  %1013 = vmatprep.mubr.bf16.mxu1 %v4423_v57 }
  0x61   :  { %v3421_v28 = vcombine.high %v162_v22, %v166_v23  ;;  %v3423_v29 = vcombine.high %v163_v24, %v167_v25  ;;  %v154_v30 = vld [vmem:[#allocation5 + $0xc0] sm:$0xff]  ;;  %v155_v32 = vld [vmem:[#allocation5 + $0xc8] sm:$0xff]  ;;  %v3420_v34 = vcombine.low %v162_v22, %v166_v23  ;;  %v3422_v35 = vcombine.low %v163_v24, %v167_v25 }
  0x62   :  { %943 = vmatpush1.bf16.msra.mxu0 %v3436_v18  ;;  %984 = vmatpush1.bf16.msra.mxu1 %v3438_v19  ;;  %v158_v31 = vld [vmem:[#allocation5 + $0xe0] sm:$0xff]  ;;  %v159_v33 = vld [vmem:[#allocation5 + $0xe8] sm:$0xff] }
  0x63   :  { %944 = vmatprep.subr.bf16.mxu0 %v3429_v20  ;;  %985 = vmatprep.subr.bf16.mxu1 %v3431_v21  ;;  %v3413_v36 = vcombine.high %v154_v30, %v158_v31  ;;  %v3415_v37 = vcombine.high %v155_v32, %v159_v33  ;;  %v146_v38 = vld [vmem:[#allocation5 + $0x80] sm:$0xff]  ;;  %v147_v40 = vld [vmem:[#allocation5 + $0x88] sm:$0xff]  ;;  %v3412_v42 = vcombine.low %v154_v30, %v158_v31 }
  0x64   :  { %v150_v39 = vld [vmem:[#allocation5 + $0xa0] sm:$0xff]  ;;  %v151_v41 = vld [vmem:[#allocation5 + $0xa8] sm:$0xff]  ;;  %v3414_v43 = vcombine.low %v155_v32, %v159_v33 }
  0x65   :  { %v3405_v44 = vcombine.high %v146_v38, %v150_v39  ;;  %v3407_v45 = vcombine.high %v147_v40, %v151_v41  ;;  %v138_v46 = vld [vmem:[#allocation5 + $0x40] sm:$0xff]  ;;  %v139_v48 = vld [vmem:[#allocation5 + $0x48] sm:$0xff]  ;;  %v3404_v50 = vcombine.low %v146_v38, %v150_v39  ;;  %v3406_v51 = vcombine.low %v147_v40, %v151_v41 }
  0x66   :  { %945 = vmatpush1.bf16.msra.mxu0 %v3428_v26  ;;  %986 = vmatpush1.bf16.msra.mxu1 %v3430_v27  ;;  %v142_v47 = vld [vmem:[#allocation5 + $0x60] sm:$0xff]  ;;  %v143_v49 = vld [vmem:[#allocation5 + $0x68] sm:$0xff] }
  0x67   :  { %946 = vmatprep.subr.bf16.mxu0 %v3421_v28  ;;  %987 = vmatprep.subr.bf16.mxu1 %v3423_v29  ;;  %v3397_v52 = vcombine.high %v138_v46, %v142_v47  ;;  %v3399_v54 = vcombine.high %v139_v48, %v143_v49  ;;  %v130_v55 = vld [vmem:[#allocation5] sm:$0xff]  ;;  %v131_v58 = vld [vmem:[#allocation5 + $0x8] sm:$0xff]  ;;  %v3396_v60 = vcombine.low %v138_v46, %v142_v47 }
  0x68   :  { %v134_v56 = vld [vmem:[#allocation5 + $0x20] sm:$0xff]  ;;  %v135_v59 = vld [vmem:[#allocation5 + $0x28] sm:$0xff]  ;;  %v3398_v61 = vcombine.low %v139_v48, %v143_v49 }
  0x69   :  { %v3389_v62 = vcombine.high %v130_v55, %v134_v56  ;;  %v3391_v63 = vcombine.high %v131_v58, %v135_v59  ;;  %v250_v0 = vld [vmem:[#allocation5 + $0x3c0] sm:$0xff]  ;;  %v251_v2 = vld [vmem:[#allocation5 + $0x3c8] sm:$0xff]  ;;  %v3388_v4 = vcombine.low %v130_v55, %v134_v56  ;;  %v3390_v5 = vcombine.low %v131_v58, %v135_v59 }
  0x6a   :  { %947 = vmatpush1.bf16.msra.mxu0 %v3420_v34  ;;  %988 = vmatpush1.bf16.msra.mxu1 %v3422_v35  ;;  %v254_v1 = vld [vmem:[#allocation5 + $0x3e0] sm:$0xff]  ;;  %v255_v3 = vld [vmem:[#allocation5 + $0x3e8] sm:$0xff] }
  0x6b   :  { %948 = vmatprep.subr.bf16.mxu0 %v3413_v36  ;;  %989 = vmatprep.subr.bf16.mxu1 %v3415_v37  ;;  %v3509_v6 = vcombine.high %v250_v0, %v254_v1  ;;  %v3511_v7 = vcombine.high %v251_v2, %v255_v3  ;;  %v242_v8 = vld [vmem:[#allocation5 + $0x380] sm:$0xff]  ;;  %v243_v10 = vld [vmem:[#allocation5 + $0x388] sm:$0xff]  ;;  %v3508_v12 = vcombine.low %v250_v0, %v254_v1  ;;  %v192_v1 = vld [vmem:[#allocation5 + $0x1f0] sm:$0xff] }
  0x6c   :  { %v246_v9 = vld [vmem:[#allocation5 + $0x3a0] sm:$0xff]  ;;  %v247_v11 = vld [vmem:[#allocation5 + $0x3a8] sm:$0xff]  ;;  %v3510_v13 = vcombine.low %v251_v2, %v255_v3  ;;  %v126_v3 = vld [vmem:[#allocation2] sm:$0xff] }
  0x6d   :  { %v3501_v14 = vcombine.high %v242_v8, %v246_v9  ;;  %v3503_v15 = vcombine.high %v243_v10, %v247_v11  ;;  %v234_v16 = vld [vmem:[#allocation5 + $0x340] sm:$0xff]  ;;  %v235_v18 = vld [vmem:[#allocation5 + $0x348] sm:$0xff]  ;;  %v3500_v20 = vcombine.low %v242_v8, %v246_v9  ;;  %v3502_v21 = vcombine.low %v243_v10, %v247_v11  ;;  %v184_v10 = vld [vmem:[#allocation5 + $0x1b0] sm:$0xff] }
  0x6e   :  { %949 = vmatpush1.bf16.msra.mxu0 %v3412_v42  ;;  %990 = vmatpush1.bf16.msra.mxu1 %v3414_v43  ;;  %v238_v17 = vld [vmem:[#allocation5 + $0x360] sm:$0xff]  ;;  %v239_v19 = vld [vmem:[#allocation5 + $0x368] sm:$0xff] }
  0x6f   :  { %950 = vmatprep.subr.bf16.mxu0 %v3405_v44  ;;  %991 = vmatprep.subr.bf16.mxu1 %v3407_v45  ;;  %v3493_v22 = vcombine.high %v234_v16, %v238_v17  ;;  %v3495_v23 = vcombine.high %v235_v18, %v239_v19  ;;  %v226_v24 = vld [vmem:[#allocation5 + $0x300] sm:$0xff]  ;;  %v227_v26 = vld [vmem:[#allocation5 + $0x308] sm:$0xff]  ;;  %v3492_v28 = vcombine.low %v234_v16, %v238_v17 }
  0x70   :  { %v230_v25 = vld [vmem:[#allocation5 + $0x320] sm:$0xff]  ;;  %v231_v27 = vld [vmem:[#allocation5 + $0x328] sm:$0xff]  ;;  %v3494_v29 = vcombine.low %v235_v18, %v239_v19  ;;  %v172_v18 = vld [vmem:[#allocation5 + $0x150] sm:$0xff] }
  0x71   :  { %v3485_v30 = vcombine.high %v226_v24, %v230_v25  ;;  %v3487_v31 = vcombine.high %v227_v26, %v231_v27  ;;  %v218_v32 = vld [vmem:[#allocation5 + $0x2c0] sm:$0xff]  ;;  %v219_v34 = vld [vmem:[#allocation5 + $0x2c8] sm:$0xff]  ;;  %v3484_v36 = vcombine.low %v226_v24, %v230_v25  ;;  %v3486_v38 = vcombine.low %v227_v26, %v231_v27  ;;  %v164_v24 = vld [vmem:[#allocation5 + $0x110] sm:$0xff] }
  0x72   :  { %951 = vmatpush1.bf16.msra.mxu0 %v3404_v50  ;;  %992 = vmatpush1.bf16.msra.mxu1 %v3406_v51  ;;  %v222_v33 = vld [vmem:[#allocation5 + $0x2e0] sm:$0xff]  ;;  %v223_v35 = vld [vmem:[#allocation5 + $0x2e8] sm:$0xff]  ;;  %v168_v25 = vld [vmem:[#allocation5 + $0x130] sm:$0xff] }
  0x73   :  { %952 = vmatprep.subr.bf16.mxu0 %v3397_v52  ;;  %993 = vmatprep.subr.bf16.mxu1 %v3399_v54  ;;  %v210_v37 = vld [vmem:[#allocation5 + $0x280] sm:$0xff]  ;;  %v3477_v39 = vcombine.high %v218_v32, %v222_v33  ;;  %v3479_v41 = vcombine.high %v219_v34, %v223_v35  ;;  %v211_v42 = vld [vmem:[#allocation5 + $0x288] sm:$0xff]  ;;  %v3476_v44 = vcombine.low %v218_v32, %v222_v33  ;;  %v156_v32 = vld [vmem:[#allocation5 + $0xd0] sm:$0xff] }
  0x74   :  { %v214_v40 = vld [vmem:[#allocation5 + $0x2a0] sm:$0xff]  ;;  %v215_v43 = vld [vmem:[#allocation5 + $0x2a8] sm:$0xff]  ;;  %v3478_v46 = vcombine.low %v219_v34, %v223_v35  ;;  %v160_v33 = vld [vmem:[#allocation5 + $0xf0] sm:$0xff]  ;;  %v3425_v35 = vcombine.high %v164_v24, %v168_v25 }
  0x75   :  { %v202_v45 = vld [vmem:[#allocation5 + $0x240] sm:$0xff]  ;;  %v3469_v47 = vcombine.high %v210_v37, %v214_v40  ;;  %v3471_v49 = vcombine.high %v211_v42, %v215_v43  ;;  %v203_v50 = vld [vmem:[#allocation5 + $0x248] sm:$0xff]  ;;  %v3468_v52 = vcombine.low %v210_v37, %v214_v40  ;;  %v3470_v54 = vcombine.low %v211_v42, %v215_v43  ;;  %v161_v37 = vld [vmem:[#allocation5 + $0xf8] sm:$0xff] }
  0x76   :  { %953 = vmatpush1.bf16.msra.mxu0 %v3396_v60  ;;  %994 = vmatpush1.bf16.msra.mxu1 %v3398_v61  ;;  %v206_v48 = vld [vmem:[#allocation5 + $0x260] sm:$0xff]  ;;  %v207_v51 = vld [vmem:[#allocation5 + $0x268] sm:$0xff]  ;;  %v148_v40 = vld [vmem:[#allocation5 + $0x90] sm:$0xff] }
  0x77   :  { %954 = vmatprep.subr.bf16.mxu0 %v3389_v62  ;;  %995 = vmatprep.subr.bf16.mxu1 %v3391_v63  ;;  %v194_v53 = vld [vmem:[#allocation5 + $0x200] sm:$0xff]  ;;  %v3461_v55 = vcombine.high %v202_v45, %v206_v48  ;;  %v3463_v58 = vcombine.high %v203_v50, %v207_v51  ;;  %v195_v59 = vld [vmem:[#allocation5 + $0x208] sm:$0xff]  ;;  %v3460_v61 = vcombine.low %v202_v45, %v206_v48  ;;  %v188_v62 = vld [vmem:[#allocation5 + $0x1d0] sm:$0xff] }
  0x78   :  { %v198_v56 = vld [vmem:[#allocation5 + $0x220] sm:$0xff]  ;;  %v199_v60 = vld [vmem:[#allocation5 + $0x228] sm:$0xff]  ;;  %v3462_v63 = vcombine.low %v203_v50, %v207_v51  ;;  %v3449_v9 = vcombine.high %v188_v62, %v192_v1  ;;  %v149_v43 = vld [vmem:[#allocation5 + $0x98] sm:$0xff] }
  0x79   :  { %v3453_v0 = vcombine.high %v194_v53, %v198_v56  ;;  %v3455_v2 = vcombine.high %v195_v59, %v199_v60  ;;  %v3454_v8 = vcombine.low %v195_v59, %v199_v60  ;;  %v144_v48 = vld [vmem:[#allocation5 + $0x70] sm:$0xff]  ;;  %v141_v51 = vld [vmem:[#allocation5 + $0x58] sm:$0xff] }
  0x7a   :  { %955 = vmatpush1.bf16.msra.mxu0 %v3388_v4  ;;  %996 = vmatpush1.bf16.msra.mxu1 %v3390_v5  ;;  %v189_v4 = vld [vmem:[#allocation5 + $0x1d8] sm:$0xff] }
  0x7b   :  { %956 = vmatprep.subr.bf16.mxu0 %v3509_v6  ;;  %997 = vmatprep.subr.bf16.mxu1 %v3511_v7  ;;  %v193_v5 = vld [vmem:[#allocation5 + $0x1f8] sm:$0xff]  ;;  %v3452_v6 = vcombine.low %v194_v53, %v198_v56  ;;  %v180_v7 = vld [vmem:[#allocation5 + $0x190] sm:$0xff] }
  0x7c   :  { %v3451_v11 = vcombine.high %v189_v4, %v193_v5  ;;  %v3450_v16 = vcombine.low %v189_v4, %v193_v5  ;;  %v3441_v17 = vcombine.high %v180_v7, %v184_v10  ;;  %v136_v56 = vld [vmem:[#allocation5 + $0x30] sm:$0xff]  ;;  %v133_v60 = vld [vmem:[#allocation5 + $0x18] sm:$0xff] }
  0x7d   :  { %v253_v4 = vld [vmem:[#allocation5 + $0x3d8] sm:$0xff] }
  0x7e   :  { %957 = vmatpush2.bf16.msra.mxu0 %v3508_v12  ;;  %998 = vmatpush2.bf16.msra.mxu1 %v3510_v13  ;;  %v181_v12 = vld [vmem:[#allocation5 + $0x198] sm:$0xff]  ;;  %v4427_v13 = vpack.c.bf16 %v126_v3, %v126_v3 }
  0x7f   :  { %958 = vmatprep.subr.bf16.mxu0 %v3501_v14  ;;  %999 = vmatprep.subr.bf16.mxu1 %v3503_v15  ;;  %v185_v14 = vld [vmem:[#allocation5 + $0x1b8] sm:$0xff]  ;;  %v3448_v15 = vcombine.low %v188_v62, %v192_v1  ;;  %v256_v1 = vld [vmem:[#allocation5 + $0x3f0] sm:$0xff] }
  0x80   :  { %v3443_v19 = vcombine.high %v181_v12, %v185_v14  ;;  %v3442_v26 = vcombine.low %v181_v12, %v185_v14  ;;  %v257_v5 = vld [vmem:[#allocation5 + $0x3f8] sm:$0xff] }
  0x81   :  { %v245_v12 = vld [vmem:[#allocation5 + $0x398] sm:$0xff] }
  0x82   :  { %959 = vmatpush2.bf16.msra.mxu0 %v3500_v20  ;;  %1000 = vmatpush2.bf16.msra.mxu1 %v3502_v21  ;;  %v176_v20 = vld [vmem:[#allocation5 + $0x170] sm:$0xff]  ;;  %v173_v21 = vld [vmem:[#allocation5 + $0x158] sm:$0xff] }
  0x83   :  { %960 = vmatprep.subr.bf16.mxu0 %v3493_v22  ;;  %1001 = vmatprep.subr.bf16.mxu1 %v3495_v23  ;;  %v177_v22 = vld [vmem:[#allocation5 + $0x178] sm:$0xff]  ;;  %v3440_v23 = vcombine.low %v180_v7, %v184_v10  ;;  %v3433_v27 = vcombine.high %v172_v18, %v176_v20 }
  0x84   :  { %v3434_v34 = vcombine.low %v173_v21, %v177_v22  ;;  %v249_v14 = vld [vmem:[#allocation5 + $0x3b8] sm:$0xff] }
  0x86   :  { %961 = vmatpush2.bf16.msra.mxu0 %v3492_v28  ;;  %1002 = vmatpush2.bf16.msra.mxu1 %v3494_v29  ;;  %v165_v28 = vld [vmem:[#allocation5 + $0x118] sm:$0xff] }
  0x87   :  { %962 = vmatprep.subr.bf16.mxu0 %v3485_v30  ;;  %1003 = vmatprep.subr.bf16.mxu1 %v3487_v31  ;;  %v169_v29 = vld [vmem:[#allocation5 + $0x138] sm:$0xff]  ;;  %v3435_v30 = vcombine.high %v173_v21, %v177_v22  ;;  %v3432_v31 = vcombine.low %v172_v18, %v176_v20  ;;  %v240_v18 = vld [vmem:[#allocation5 + $0x370] sm:$0xff] }
  0x88   :  { %v3426_v42 = vcombine.low %v165_v28, %v169_v29  ;;  %v237_v21 = vld [vmem:[#allocation5 + $0x358] sm:$0xff] }
  0x89   :  { %v241_v22 = vld [vmem:[#allocation5 + $0x378] sm:$0xff] }
  0x8a   :  { %963 = vmatpush2.bf16.msra.mxu0 %v3484_v36  ;;  %1004 = vmatpush2.bf16.msra.mxu1 %v3486_v38  ;;  %v157_v36 = vld [vmem:[#allocation5 + $0xd8] sm:$0xff]  ;;  %v3427_v38 = vcombine.high %v165_v28, %v169_v29 }
  0x8b   :  { %964 = vmatprep.subr.bf16.mxu0 %v3477_v39  ;;  %1005 = vmatprep.subr.bf16.mxu1 %v3479_v41  ;;  %v3424_v39 = vcombine.low %v164_v24, %v168_v25  ;;  %v152_v41 = vld [vmem:[#allocation5 + $0xb0] sm:$0xff]  ;;  %v3419_v45 = vcombine.high %v157_v36, %v161_v37  ;;  %v229_v29 = vld [vmem:[#allocation5 + $0x318] sm:$0xff] }
  0x8c   :  { %v3409_v50 = vcombine.high %v148_v40, %v152_v41  ;;  %v228_v25 = vld [vmem:[#allocation5 + $0x310] sm:$0xff] }
  0x8e   :  { %965 = vmatpush2.bf16.msra.mxu0 %v3476_v44  ;;  %1006 = vmatpush2.bf16.msra.mxu1 %v3478_v46  ;;  %v153_v44 = vld [vmem:[#allocation5 + $0xb8] sm:$0xff]  ;;  %v3416_v46 = vcombine.low %v156_v32, %v160_v33 }
  0x8f   :  { %966 = vmatprep.subr.bf16.mxu0 %v3469_v47  ;;  %1007 = vmatprep.subr.bf16.mxu1 %v3471_v49  ;;  %v140_v47 = vld [vmem:[#allocation5 + $0x50] sm:$0xff]  ;;  %v3418_v49 = vcombine.low %v157_v36, %v161_v37  ;;  %v3411_v53 = vcombine.high %v149_v43, %v153_v44  ;;  %v221_v37 = vld [vmem:[#allocation5 + $0x2d8] sm:$0xff] }
  0x90   :  { %v3401_v59 = vcombine.high %v140_v47, %v144_v48 }
  0x92   :  { %967 = vmatpush2.bf16.msra.mxu0 %v3468_v52  ;;  %1008 = vmatpush2.bf16.msra.mxu1 %v3470_v54  ;;  %v145_v52 = vld [vmem:[#allocation5 + $0x78] sm:$0xff]  ;;  %v3408_v54 = vcombine.low %v148_v40, %v152_v41  ;;  %v212_v41 = vld [vmem:[#allocation5 + $0x290] sm:$0xff] }
  0x93   :  { %968 = vmatprep.subr.bf16.mxu0 %v3461_v55  ;;  %1009 = vmatprep.subr.bf16.mxu1 %v3463_v58  ;;  %v132_v55 = vld [vmem:[#allocation5 + $0x10] sm:$0xff]  ;;  %v3410_v58 = vcombine.low %v149_v43, %v153_v44  ;;  %v3403_v62 = vcombine.high %v141_v51, %v145_v52  ;;  %v213_v44 = vld [vmem:[#allocation5 + $0x298] sm:$0xff] }
  0x94   :  { %v3393_v3 = vcombine.high %v132_v55, %v136_v56  ;;  %v3392_v7 = vcombine.low %v132_v55, %v136_v56  ;;  %v196_v56 = vld [vmem:[#allocation5 + $0x210] sm:$0xff] }
  0x96   :  { %969 = vmatpush2.bf16.msra.mxu0 %v3460_v61  ;;  %1010 = vmatpush2.bf16.msra.mxu1 %v3462_v63  ;;  %v137_v61 = vld [vmem:[#allocation5 + $0x38] sm:$0xff]  ;;  %v3400_v63 = vcombine.low %v140_v47, %v144_v48  ;;  %v204_v48 = vld [vmem:[#allocation5 + $0x250] sm:$0xff] }
  0x97   :  { %970 = vmatprep.subr.bf16.mxu0 %v3453_v0  ;;  %1011 = vmatprep.subr.bf16.mxu1 %v3455_v2  ;;  %v252_v0 = vld [vmem:[#allocation5 + $0x3d0] sm:$0xff]  ;;  %v3402_v2 = vcombine.low %v141_v51, %v145_v52  ;;  %v3394_v10 = vcombine.low %v133_v60, %v137_v61  ;;  %v205_v52 = vld [vmem:[#allocation5 + $0x258] sm:$0xff] }
  0x9a   :  { %971 = vmatpush2.bf16.msra.mxu0 %v3452_v6  ;;  %1012 = vmatpush2.bf16.msra.mxu1 %v3454_v8  ;;  %v3395_v6 = vcombine.high %v133_v60, %v137_v61  ;;  %v244_v8 = vld [vmem:[#allocation5 + $0x390] sm:$0xff]  ;;  %v197_v61 = vld [vmem:[#allocation5 + $0x218] sm:$0xff] }
  0x9b   :  { %1022 = vmatprep.subr.bf16.mxu0 %v3449_v9  ;;  %1063 = vmatprep.subr.bf16.mxu1 %v3451_v11  ;;  %v248_v9 = vld [vmem:[#allocation5 + $0x3b0] sm:$0xff]  ;;  %v3513_v11 = vcombine.high %v252_v0, %v256_v1 }
  0x9c   :  { %v3505_v20 = vcombine.high %v244_v8, %v248_v9  ;;  %v3504_v24 = vcombine.low %v244_v8, %v248_v9  ;;  %v3879_v8 = vld [vmem:[#allocation8 + $0x38] sm:$0xff]  }
  0x9d   :  { %973 = vmatmul.mubr.bf16.vlgmr.msra.gmra.mxu0 %v4427_v13  ;;  %1014 = vmatmul.mubr.bf16.vlgmr.msra.gmra.mxu1 %v4427_v13  ;;  %v3880_v9 = vld [vmem:[#allocation8 + $0xb8] sm:$0xff]  }
  0x9e   :  { %1023 = vmatpush1.bf16.msra.mxu0 %v3448_v15  ;;  %1064 = vmatpush1.bf16.msra.mxu1 %v3450_v16  ;;  %v3515_v15 = vcombine.high %v253_v4, %v257_v5  ;;  %v3512_v16 = vcombine.low %v252_v0, %v256_v1 }
  0x9f   :  { %1024 = vmatprep.subr.bf16.mxu0 %v3441_v17  ;;  %1065 = vmatprep.subr.bf16.mxu1 %v3443_v19  ;;  %v236_v17 = vld [vmem:[#allocation5 + $0x350] sm:$0xff]  ;;  %v3514_v19 = vcombine.low %v253_v4, %v257_v5  ;;  %v3877_v4 = vld [vmem:[#allocation8 + $0x78] sm:$0xff]  }
  0xa0   :  { %1054 = vmatprep.mubr.bf16.mxu0 %v4423_v57  ;;  %1095 = vmatprep.mubr.bf16.mxu1 %v4423_v57  ;;  %v3417_v57 = vcombine.high %v156_v32, %v160_v33  ;;  %v3497_v28 = vcombine.high %v236_v17, %v240_v18  ;;  %v3496_v32 = vcombine.low %v236_v17, %v240_v18  ;;  %v220_v33 = vld [vmem:[#allocation5 + $0x2d0] sm:$0xff] }
  0xa1   :  { %v3887_v17 = vld [vmem:[#allocation8 + $0x28] sm:$0xff]  }
  0xa2   :  { %1025 = vmatpush1.bf16.msra.mxu0 %v3440_v23  ;;  %1066 = vmatpush1.bf16.msra.mxu1 %v3442_v26  ;;  %v3507_v23 = vcombine.high %v245_v12, %v249_v14  ;;  %v232_v26 = vld [vmem:[#allocation5 + $0x330] sm:$0xff] }
  0xa3   :  { %1026 = vmatprep.subr.bf16.mxu0 %v3433_v27  ;;  %1067 = vmatprep.subr.bf16.mxu1 %v3435_v30  ;;  %v3506_v27 = vcombine.low %v245_v12, %v249_v14  ;;  %v233_v30 = vld [vmem:[#allocation5 + $0x338] sm:$0xff]  ;;  %v3489_v36 = vcombine.high %v228_v25, %v232_v26  ;;  %v3488_v40 = vcombine.low %v228_v25, %v232_v26  ;;  %v3888_v18 = vld [vmem:[#allocation8 + $0xa8] sm:$0xff]   ;;  %v3896_v25 = vld [vmem:[#allocation8 + $0x98] sm:$0xff]  }
  0xa4   :  { %v3883_v12 = vld [vmem:[#allocation8 + $0x30] sm:$0xff]  }
  0xa5   :  { %v3884_v14 = vld [vmem:[#allocation8 + $0xb0] sm:$0xff]  }
  0xa6   :  { %1027 = vmatpush1.bf16.msra.mxu0 %v3432_v31  ;;  %1068 = vmatpush1.bf16.msra.mxu1 %v3434_v34  ;;  %v3499_v31 = vcombine.high %v237_v21, %v241_v22  ;;  %v224_v34 = vld [vmem:[#allocation5 + $0x2f0] sm:$0xff]  ;;  %v3897_v26 = vld [vmem:[#allocation8 + $0x50] sm:$0xff]  }
  0xa7   :  { %1028 = vmatprep.subr.bf16.mxu0 %v3425_v35  ;;  %1069 = vmatprep.subr.bf16.mxu1 %v3427_v38  ;;  %v3498_v35 = vcombine.low %v237_v21, %v241_v22  ;;  %v225_v38 = vld [vmem:[#allocation5 + $0x2f8] sm:$0xff]  ;;  %v3481_v43 = vcombine.high %v220_v33, %v224_v34  ;;  %v3480_v47 = vcombine.low %v220_v33, %v224_v34  ;;  %v3891_v21 = vld [vmem:[#allocation8 + $0x20] sm:$0xff]   ;;  %v3893_v22 = vld [vmem:[#allocation8 + $0x58] sm:$0xff]  }
  0xa8   :  { %v3904_v33 = vld [vmem:[#allocation8 + $0x88] sm:$0xff]   ;;  %v3905_v34 = vld [vmem:[#allocation8 + $0x40] sm:$0xff]  }
  0xaa   :  { %1029 = vmatpush1.bf16.msra.mxu0 %v3424_v39  ;;  %1070 = vmatpush1.bf16.msra.mxu1 %v3426_v42  ;;  %v3491_v39 = vcombine.high %v229_v29, %v233_v30  ;;  %v216_v42 = vld [vmem:[#allocation5 + $0x2b0] sm:$0xff] }
  0xab   :  { %1030 = vmatprep.subr.bf16.mxu0 %v3417_v57  ;;  %1071 = vmatprep.subr.bf16.mxu1 %v3419_v45  ;;  %v3490_v57 = vcombine.low %v229_v29, %v233_v30  ;;  %v217_v45 = vld [vmem:[#allocation5 + $0x2b8] sm:$0xff]  ;;  %v3473_v51 = vcombine.high %v212_v41, %v216_v42  ;;  %v3472_v55 = vcombine.low %v212_v41, %v216_v42  ;;  %v3901_v30 = vld [vmem:[#allocation8 + $0x48] sm:$0xff]  }
  0xac   :  { %v3900_v29 = vld [vmem:[#allocation8 + $0x90] sm:$0xff]  }
  0xae   :  { %1031 = vmatpush1.bf16.msra.mxu0 %v3416_v46  ;;  %1072 = vmatpush1.bf16.msra.mxu1 %v3418_v49  ;;  %v3483_v46 = vcombine.high %v221_v37, %v225_v38  ;;  %v208_v49 = vld [vmem:[#allocation5 + $0x270] sm:$0xff] }
  0xaf   :  { %1032 = vmatprep.subr.bf16.mxu0 %v3409_v50  ;;  %1073 = vmatprep.subr.bf16.mxu1 %v3411_v53  ;;  %v3482_v50 = vcombine.low %v221_v37, %v225_v38  ;;  %v209_v53 = vld [vmem:[#allocation5 + $0x278] sm:$0xff]  ;;  %v3465_v60 = vcombine.high %v204_v48, %v208_v49  ;;  %v3464_v0 = vcombine.low %v204_v48, %v208_v49  ;;  %v3908_v37 = vld [vmem:[#allocation8 + $0x80] sm:$0xff]   ;;  %v3909_v38 = vld [vmem:[#allocation8 + $0x178] sm:$0xff]  }
  0xb0   :  { %v3466_v1 = vcombine.low %v205_v52, %v209_v53 }
  0xb2   :  { %1033 = vmatpush1.bf16.msra.mxu0 %v3408_v54  ;;  %1074 = vmatpush1.bf16.msra.mxu1 %v3410_v58  ;;  %v3475_v54 = vcombine.high %v213_v44, %v217_v45  ;;  %v200_v58 = vld [vmem:[#allocation5 + $0x230] sm:$0xff] }
  0xb3   :  { %1034 = vmatprep.subr.bf16.mxu0 %v3401_v59  ;;  %1075 = vmatprep.subr.bf16.mxu1 %v3403_v62  ;;  %v3474_v59 = vcombine.low %v213_v44, %v217_v45  ;;  %v201_v62 = vld [vmem:[#allocation5 + $0x238] sm:$0xff]  ;;  %v3456_v5 = vcombine.low %v196_v56, %v200_v58 }
  0xb6   :  { %1035 = vmatpush1.bf16.msra.mxu0 %v3400_v63  ;;  %1076 = vmatpush1.bf16.msra.mxu1 %v3402_v2  ;;  %v3467_v63 = vcombine.high %v205_v52, %v209_v53  ;;  %v3457_v2 = vcombine.high %v196_v56, %v200_v58 }
  0xb7   :  { %1036 = vmatprep.subr.bf16.mxu0 %v3393_v3  ;;  %1077 = vmatprep.subr.bf16.mxu1 %v3395_v6  ;;  %v3459_v3 = vcombine.high %v197_v61, %v201_v62  ;;  %v3878_v6 = vld [vmem:[#allocation8 + $0xf8] sm:$0xff]  }
  0xba   :  { %1037 = vmatpush1.bf16.msra.mxu0 %v3392_v7  ;;  %1078 = vmatpush1.bf16.msra.mxu1 %v3394_v10  ;;  %v3458_v7 = vcombine.low %v197_v61, %v201_v62  ;;  %v3881_v10 = vld [vmem:[#allocation8 + $0x70] sm:$0xff]  }
  0xbb   :  { %1038 = vmatprep.subr.bf16.mxu0 %v3513_v11  ;;  %1079 = vmatprep.subr.bf16.mxu1 %v3515_v15  ;;  %v3882_v11 = vld [vmem:[#allocation8 + $0xf0] sm:$0xff]   ;;  %v3885_v15 = vld [vmem:[#allocation8 + $0x68] sm:$0xff]  }
  0xbe   :  { %1039 = vmatpush2.bf16.msra.mxu0 %v3512_v16  ;;  %1080 = vmatpush2.bf16.msra.mxu1 %v3514_v19  ;;  %v3886_v16 = vld [vmem:[#allocation8 + $0xe8] sm:$0xff]   ;;  %v3889_v19 = vld [vmem:[#allocation8 + $0x60] sm:$0xff]  }
  0xbf   :  { %1040 = vmatprep.subr.bf16.mxu0 %v3505_v20  ;;  %1081 = vmatprep.subr.bf16.mxu1 %v3507_v23  ;;  %v3890_v20 = vld [vmem:[#allocation8 + $0xe0] sm:$0xff]   ;;  %v3894_v23 = vld [vmem:[#allocation8 + $0xd8] sm:$0xff]  }
  0xc2   :  { %1041 = vmatpush2.bf16.msra.mxu0 %v3504_v24  ;;  %1082 = vmatpush2.bf16.msra.mxu1 %v3506_v27  ;;  %v3895_v24 = vld [vmem:[#allocation8 + $0x18] sm:$0xff]   ;;  %v3898_v27 = vld [vmem:[#allocation8 + $0xd0] sm:$0xff]  }
  0xc3   :  { %1042 = vmatprep.subr.bf16.mxu0 %v3497_v28  ;;  %1083 = vmatprep.subr.bf16.mxu1 %v3499_v31  ;;  %v3899_v28 = vld [vmem:[#allocation8 + $0x10] sm:$0xff]   ;;  %v3902_v31 = vld [vmem:[#allocation8 + $0xc8] sm:$0xff]  }
  0xc6   :  { %1043 = vmatpush2.bf16.msra.mxu0 %v3496_v32  ;;  %1084 = vmatpush2.bf16.msra.mxu1 %v3498_v35  ;;  %v3903_v32 = vld [vmem:[#allocation8 + $0x8] sm:$0xff]   ;;  %v3906_v35 = vld [vmem:[#allocation8 + $0xc0] sm:$0xff]  }
  0xc7   :  { %1044 = vmatprep.subr.bf16.mxu0 %v3489_v36  ;;  %1085 = vmatprep.subr.bf16.mxu1 %v3491_v39  ;;  %v3907_v36 = vld [vmem:[#allocation8] sm:$0xff]   ;;  %v3910_v39 = vld [vmem:[#allocation8 + $0x1f8] sm:$0xff]  }
  0xca   :  { %1045 = vmatpush2.bf16.msra.mxu0 %v3488_v40  ;;  %1086 = vmatpush2.bf16.msra.mxu1 %v3490_v57  ;;  %v260_v40 = vlaneseq  ;;  %v4440_v57 = vld [vmem:[#allocation7] sm:$0xff] }
  0xcb   :  { %1046 = vmatprep.subr.bf16.mxu0 %v3481_v43  ;;  %1087 = vmatprep.subr.bf16.mxu1 %v3483_v46 }
  0xcc   :  { %v4435_v41 = vshrl.u32 %v260_v40, 7 }
  0xce   :  { %1047 = vmatpush2.bf16.msra.mxu0 %v3480_v47  ;;  %1088 = vmatpush2.bf16.msra.mxu1 %v3482_v50  ;;  %v4438_v42 = vsub.s32 0, %v4435_v41  ;;  %v270_v43 = vsub.s32 2, %v4435_v41  ;;  %v4444_v44 = vsub.s32 1, %v4435_v41  ;;  %v274_v45 = vsub.s32 3, %v4435_v41 }
  0xcf   :  { %1048 = vmatprep.subr.bf16.mxu0 %v3473_v51  ;;  %1089 = vmatprep.subr.bf16.mxu1 %v3475_v54  ;;  %v290_v40 = vsub.s32 7, %v4435_v41 }
  0xd0   :  { %v263_v46 = vrot.slane %v4440_v57, %v4438_v42  ;;  %v271_v47 = vrot.slane %v4440_v57, %v270_v43  ;;  %v267_v48 = vrot.slane %v4440_v57, %v4444_v44  ;;  %v275_v50 = vrot.slane %v4440_v57, %v274_v45 }
  0xd2   :  { %1049 = vmatpush2.bf16.msra.mxu0 %v3472_v55  ;;  %1090 = vmatpush2.bf16.msra.mxu1 %v3474_v59 }
  0xd3   :  { %1050 = vmatprep.subr.bf16.mxu0 %v3465_v60  ;;  %1091 = vmatprep.subr.bf16.mxu1 %v3467_v63 }
  0xd6   :  { %1051 = vmatpush2.bf16.msra.mxu0 %v3464_v0  ;;  %1092 = vmatpush2.bf16.msra.mxu1 %v3466_v1 }
  0xd7   :  { %1052 = vmatprep.subr.bf16.mxu0 %v3457_v2  ;;  %1093 = vmatprep.subr.bf16.mxu1 %v3459_v3 }
  0xda   :  { %1053 = vmatpush2.bf16.msra.mxu0 %v3456_v5  ;;  %1094 = vmatpush2.bf16.msra.mxu1 %v3458_v7  ;;  %v3911_v5 = vld [vmem:[#allocation8 + $0x138] sm:$0xff]  }
  0xdb   :  { %3773 = vmatprep.subr.bf16.mxu0 %v3877_v4  ;;  %3795 = vmatprep.subr.bf16.mxu1 %v3878_v6 }
  0xdd   :  { %1055 = vmatmul.mubr.bf16.vlgmr.msra.gmra.mxu0 %v4427_v13  ;;  %1096 = vmatmul.mubr.bf16.vlgmr.msra.gmra.mxu1 %v4427_v13  ;;  %v3892_v13 = vld [vmem:[#allocation8 + $0xa0] sm:$0xff]  }
  0xde   :  { %3774 = vmatpush3.bf16.msra.mxu0 %v3879_v8  ;;  %3796 = vmatpush3.bf16.msra.mxu1 %v3880_v9  ;;  %v3912_v8 = vld [vmem:[#allocation8 + $0x1b8] sm:$0xff]   ;;  %v3913_v9 = vld [vmem:[#allocation8 + $0x170] sm:$0xff]  }
  0xdf   :  { %3775 = vmatprep.subr.bf16.mxu0 %v3881_v10  ;;  %3797 = vmatprep.subr.bf16.mxu1 %v3882_v11  ;;  %v3914_v10 = vld [vmem:[#allocation8 + $0x1f0] sm:$0xff]  }
  0xe0   :  { %v3915_v11 = vld [vmem:[#allocation8 + $0x130] sm:$0xff]  }
  0xe2   :  { %3776 = vmatpush3.bf16.msra.mxu0 %v3883_v12  ;;  %3798 = vmatpush3.bf16.msra.mxu1 %v3884_v14  ;;  %v3916_v12 = vld [vmem:[#allocation8 + $0x1b0] sm:$0xff]   ;;  %v3917_v14 = vld [vmem:[#allocation8 + $0x168] sm:$0xff]  }
  0xe3   :  { %3777 = vmatprep.subr.bf16.mxu0 %v3885_v15  ;;  %3799 = vmatprep.subr.bf16.mxu1 %v3886_v16  ;;  %v3918_v15 = vld [vmem:[#allocation8 + $0x1e8] sm:$0xff]  }
  0xe4   :  { %v3919_v16 = vld [vmem:[#allocation8 + $0x128] sm:$0xff]  }
  0xe6   :  { %3778 = vmatpush3.bf16.msra.mxu0 %v3887_v17  ;;  %3800 = vmatpush3.bf16.msra.mxu1 %v3888_v18  ;;  %v3920_v17 = vld [vmem:[#allocation8 + $0x1a8] sm:$0xff]   ;;  %v3921_v18 = vld [vmem:[#allocation8 + $0x160] sm:$0xff]  }
  0xe7   :  { %3779 = vmatprep.subr.bf16.mxu0 %v3889_v19  ;;  %3801 = vmatprep.subr.bf16.mxu1 %v3890_v20  ;;  %v3922_v19 = vld [vmem:[#allocation8 + $0x1e0] sm:$0xff]  }
  0xe8   :  { %v3923_v20 = vld [vmem:[#allocation8 + $0x120] sm:$0xff]  }
  0xea   :  { %3780 = vmatpush3.bf16.msra.mxu0 %v3891_v21  ;;  %3802 = vmatpush3.bf16.msra.mxu1 %v3892_v13  ;;  %v3924_v21 = vld [vmem:[#allocation8 + $0x1a0] sm:$0xff]   ;;  %v3925_v13 = vld [vmem:[#allocation8 + $0x158] sm:$0xff]  }
  0xeb   :  { %3781 = vmatprep.subr.bf16.mxu0 %v3893_v22  ;;  %3803 = vmatprep.subr.bf16.mxu1 %v3894_v23  ;;  %v3926_v22 = vld [vmem:[#allocation8 + $0x1d8] sm:$0xff]  }
  0xec   :  { %v3927_v23 = vld [vmem:[#allocation8 + $0x118] sm:$0xff]  }
  0xee   :  { %3782 = vmatpush3.bf16.msra.mxu0 %v3895_v24  ;;  %3804 = vmatpush3.bf16.msra.mxu1 %v3896_v25  ;;  %v3928_v24 = vld [vmem:[#allocation8 + $0x198] sm:$0xff]   ;;  %v3929_v25 = vld [vmem:[#allocation8 + $0x150] sm:$0xff]  }
  0xef   :  { %3783 = vmatprep.subr.bf16.mxu0 %v3897_v26  ;;  %3805 = vmatprep.subr.bf16.mxu1 %v3898_v27  ;;  %v3930_v26 = vld [vmem:[#allocation8 + $0x1d0] sm:$0xff]  }
  0xf0   :  { %v3931_v27 = vld [vmem:[#allocation8 + $0x110] sm:$0xff]  }
  0xf2   :  { %3784 = vmatpush3.bf16.msra.mxu0 %v3899_v28  ;;  %3806 = vmatpush3.bf16.msra.mxu1 %v3900_v29  ;;  %v3932_v28 = vld [vmem:[#allocation8 + $0x190] sm:$0xff]   ;;  %v3933_v29 = vld [vmem:[#allocation8 + $0x148] sm:$0xff]  }
  0xf3   :  { %3785 = vmatprep.subr.bf16.mxu0 %v3901_v30  ;;  %3807 = vmatprep.subr.bf16.mxu1 %v3902_v31  ;;  %v3934_v30 = vld [vmem:[#allocation8 + $0x1c8] sm:$0xff]  }
  0xf4   :  { %v3935_v31 = vld [vmem:[#allocation8 + $0x108] sm:$0xff]  }
  0xf6   :  { %3786 = vmatpush3.bf16.msra.mxu0 %v3903_v32  ;;  %3808 = vmatpush3.bf16.msra.mxu1 %v3904_v33  ;;  %v3936_v32 = vld [vmem:[#allocation8 + $0x188] sm:$0xff]   ;;  %v3937_v33 = vld [vmem:[#allocation8 + $0x140] sm:$0xff]  }
  0xf7   :  { %3787 = vmatprep.subr.bf16.mxu0 %v3905_v34  ;;  %3809 = vmatprep.subr.bf16.mxu1 %v3906_v35  ;;  %v3938_v34 = vld [vmem:[#allocation8 + $0x1c0] sm:$0xff]  }
  0xf8   :  { %v3939_v35 = vld [vmem:[#allocation8 + $0x100] sm:$0xff]  }
  0xfa   :  { %3788 = vmatpush3.bf16.msra.mxu0 %v3907_v36  ;;  %3810 = vmatpush3.bf16.msra.mxu1 %v3908_v37  ;;  %v3940_v36 = vld [vmem:[#allocation8 + $0x180] sm:$0xff]   ;;  %v278_v37 = vsub.s32 4, %v4435_v41 }
  0xfb   :  { %3817 = vmatprep.subr.bf16.mxu0 %v3909_v38  ;;  %3839 = vmatprep.subr.bf16.mxu1 %v3910_v39  ;;  %v286_v38 = vsub.s32 6, %v4435_v41  ;;  %v282_v39 = vsub.s32 5, %v4435_v41  ;;  %v4127_v41 = vld [vmem:[#allocation13 + $0x280] ss:$8 sps:$4 sm:$0xff]  }
 0x15d   :  { %v974_v49 = vpop.f32.mrf.mxu0  ;;  %v1015_v52 = vpop.f32.mrf.mxu1 }
 0x15e   :  { %v975_v51 = vadd.f32 %v974_v49, %v263_v46  ;;  %v1016_v53 = vadd.f32 %v1015_v52, %v271_v47  ;;  %v279_v46 = vrot.slane %v4440_v57, %v278_v37  ;;  %v287_v47 = vrot.slane %v4440_v57, %v286_v38 }
 0x15f   :  { %v976_v54 = vpop.f32.mrf.mxu0  ;;  %v1017_v56 = vpop.f32.mrf.mxu1 }
 0x160   :  { %v977_v55 = vadd.f32 %v976_v54, %v267_v48  ;;  %v1104_v58 = vmax.f32 %v975_v51, 0.0  ;;  %v1106_v59 = vmax.f32 %v1016_v53, 0.0  ;;  %v1018_v60 = vadd.f32 %v1017_v56, %v275_v50 }
 0x161   :  { %v978_v61 = vpop.f32.mrf.mxu0  ;;  %v1019_v63 = vpop.f32.mrf.mxu1  ;;  %v283_v48 = vrot.slane %v4440_v57, %v282_v39  ;;  %v291_v50 = vrot.slane %v4440_v57, %v290_v40  ;;  %v1858_v57 = vld [vmem:[#allocation11 + $0x1c0] sm:$0xff] }
 0x162   :  { %v1105_v62 = vmax.f32 %v977_v55, 0.0  ;;  %v1107_v0 = vmax.f32 %v1018_v60, 0.0  ;;  %v1114_v2 = vpack.c.bf16 %v1106_v59, %v1106_v59  ;;  %v1112_v6 = vpack.c.bf16 %v1104_v58, %v1104_v58 }
 0x163   :  { %v979_v1 = vpop.f32.mrf.mxu0  ;;  %v1020_v4 = vpop.f32.mrf.mxu1 }
 0x164   :  { %v1113_v3 = vpack.c.bf16 %v1105_v62, %v1105_v62  ;;  %v1115_v7 = vpack.c.bf16 %v1107_v0, %v1107_v0 }
 0x166   :  { %1671 = vmatprep.mubr.bf16.mxu0 %v1113_v3  ;;  %1711 = vmatprep.mubr.bf16.mxu1 %v1115_v7  ;;  %v1862_v7 = vld [vmem:[#allocation11 + $0x1e0] sm:$0xff] }
 0x167   :  { %1672 = vmatmul.mubr.bf16.vlgmr.msra.gmra.mxu0 %v1112_v6  ;;  %1712 = vmatmul.mubr.bf16.vlgmr.msra.gmra.mxu1 %v1114_v2 }
 0x168   :  { %3818 = vmatpush3.bf16.msra.mxu0 %v3911_v5  ;;  %3840 = vmatpush3.bf16.msra.mxu1 %v3912_v8  ;;  %v1859_v8 = vld [vmem:[#allocation11 + $0x1c8] sm:$0xff] }
 0x169   :  { %3819 = vmatprep.subr.bf16.mxu0 %v3913_v9  ;;  %3841 = vmatprep.subr.bf16.mxu1 %v3914_v10  ;;  %v3637_v9 = vcombine.low %v1858_v57, %v1862_v7  ;;  %v3638_v10 = vcombine.high %v1858_v57, %v1862_v7  ;;  %v1802_v7 = vld [vmem:[#allocation11] sm:$0xff] }
 0x16c   :  { %3820 = vmatpush3.bf16.msra.mxu0 %v3915_v11  ;;  %3842 = vmatpush3.bf16.msra.mxu1 %v3916_v12  ;;  %v1863_v11 = vld [vmem:[#allocation11 + $0x1e8] sm:$0xff]  ;;  %v1850_v12 = vld [vmem:[#allocation11 + $0x180] sm:$0xff] }
 0x16d   :  { %3821 = vmatprep.subr.bf16.mxu0 %v3917_v14  ;;  %3843 = vmatprep.subr.bf16.mxu1 %v3918_v15  ;;  %v1854_v14 = vld [vmem:[#allocation11 + $0x1a0] sm:$0xff]  ;;  %v3639_v15 = vcombine.low %v1859_v8, %v1863_v11 }
 0x170   :  { %3822 = vmatpush3.bf16.msra.mxu0 %v3919_v16  ;;  %3844 = vmatpush3.bf16.msra.mxu1 %v3920_v17  ;;  %v3640_v16 = vcombine.high %v1859_v8, %v1863_v11  ;;  %v3630_v17 = vcombine.high %v1850_v12, %v1854_v14  ;;  %v1806_v8 = vld [vmem:[#allocation11 + $0x20] sm:$0xff]  ;;  %v1807_v11 = vld [vmem:[#allocation11 + $0x28] sm:$0xff] }
 0x171   :  { %3823 = vmatprep.subr.bf16.mxu0 %v3921_v18  ;;  %3845 = vmatprep.subr.bf16.mxu1 %v3922_v19  ;;  %v1851_v18 = vld [vmem:[#allocation11 + $0x188] sm:$0xff] }
 0x172   :  { %v1855_v19 = vld [vmem:[#allocation11 + $0x1a8] sm:$0xff] }
 0x174   :  { %3824 = vmatpush3.bf16.msra.mxu0 %v3923_v20  ;;  %3846 = vmatpush3.bf16.msra.mxu1 %v3924_v21  ;;  %v1842_v20 = vld [vmem:[#allocation11 + $0x140] sm:$0xff]  ;;  %v3632_v21 = vcombine.high %v1851_v18, %v1855_v19 }
 0x175   :  { %3825 = vmatprep.subr.bf16.mxu0 %v3925_v13  ;;  %3847 = vmatprep.subr.bf16.mxu1 %v3926_v22  ;;  %v1846_v13 = vld [vmem:[#allocation11 + $0x160] sm:$0xff]  ;;  %v1843_v22 = vld [vmem:[#allocation11 + $0x148] sm:$0xff] }
 0x178   :  { %3826 = vmatpush3.bf16.msra.mxu0 %v3927_v23  ;;  %3848 = vmatpush3.bf16.msra.mxu1 %v3928_v24  ;;  %v1847_v23 = vld [vmem:[#allocation11 + $0x168] sm:$0xff]  ;;  %v3629_v24 = vcombine.low %v1850_v12, %v1854_v14  ;;  %v3581_v12 = vcombine.low %v1802_v7, %v1806_v8 }
 0x179   :  { %3827 = vmatprep.subr.bf16.mxu0 %v3929_v25  ;;  %3849 = vmatprep.subr.bf16.mxu1 %v3930_v26  ;;  %v3631_v25 = vcombine.low %v1851_v18, %v1855_v19  ;;  %v3622_v26 = vcombine.high %v1842_v20, %v1846_v13  ;;  %v1861_v18 = vld [vmem:[#allocation11 + $0x1d8] sm:$0xff] }
 0x17c   :  { %3828 = vmatpush3.bf16.msra.mxu0 %v3931_v27  ;;  %3850 = vmatpush3.bf16.msra.mxu1 %v3932_v28  ;;  %v3624_v27 = vcombine.high %v1843_v22, %v1847_v23  ;;  %v1834_v28 = vld [vmem:[#allocation11 + $0x100] sm:$0xff] }
 0x17d   :  { %3829 = vmatprep.subr.bf16.mxu0 %v3933_v29  ;;  %3851 = vmatprep.subr.bf16.mxu1 %v3934_v30  ;;  %v1838_v29 = vld [vmem:[#allocation11 + $0x120] sm:$0xff]  ;;  %v1835_v30 = vld [vmem:[#allocation11 + $0x108] sm:$0xff] }
 0x180   :  { %3830 = vmatpush3.bf16.msra.mxu0 %v3935_v31  ;;  %3852 = vmatpush3.bf16.msra.mxu1 %v3936_v32  ;;  %v1839_v31 = vld [vmem:[#allocation11 + $0x128] sm:$0xff]  ;;  %v3621_v32 = vcombine.low %v1842_v20, %v1846_v13  ;;  %v4338_v13 = vmov 0  }
 0x181   :  { %3831 = vmatprep.subr.bf16.mxu0 %v3937_v33  ;;  %3853 = vmatprep.subr.bf16.mxu1 %v3938_v34  ;;  %v3623_v33 = vcombine.low %v1843_v22, %v1847_v23  ;;  %v3614_v34 = vcombine.high %v1834_v28, %v1838_v29 }
 0x184   :  { %3832 = vmatpush3.bf16.msra.mxu0 %v3939_v35  ;;  %3854 = vmatpush3.bf16.msra.mxu1 %v3940_v36  ;;  %v3616_v35 = vcombine.high %v1835_v30, %v1839_v31  ;;  %v1826_v36 = vld [vmem:[#allocation11 + $0xc0] sm:$0xff] }
 0x185   :  { %2228 = vmatprep.subr.bf16.mxu0 %v3638_v10  ;;  %2269 = vmatprep.subr.bf16.mxu1 %v3640_v16  ;;  %v3582_v10 = vcombine.high %v1802_v7, %v1806_v8  ;;  %v1860_v16 = vld [vmem:[#allocation11 + $0x1d0] sm:$0xff] }
 0x19d   :  { %v1056_v49 = vpop.f32.mrf.mxu0  ;;  %v1097_v52 = vpop.f32.mrf.mxu1 }
 0x19e   :  { %v1057_v51 = vadd.f32 %v1056_v49, %v279_v46  ;;  %v1098_v53 = vadd.f32 %v1097_v52, %v287_v47  ;;  %v1830_v46 = vld [vmem:[#allocation11 + $0xe0] sm:$0xff]  ;;  %v1827_v47 = vld [vmem:[#allocation11 + $0xc8] sm:$0xff]  ;;  %v3613_v49 = vcombine.low %v1834_v28, %v1838_v29 }
 0x19f   :  { %v1058_v54 = vpop.f32.mrf.mxu0  ;;  %v1099_v56 = vpop.f32.mrf.mxu1 }
 0x1a0   :  { %v1059_v55 = vadd.f32 %v1058_v54, %v283_v48  ;;  %v1108_v58 = vmax.f32 %v1057_v51, 0.0  ;;  %v1110_v59 = vmax.f32 %v1098_v53, 0.0  ;;  %v1100_v60 = vadd.f32 %v1099_v56, %v291_v50  ;;  %v1831_v48 = vld [vmem:[#allocation11 + $0xe8] sm:$0xff]  ;;  %v1822_v56 = vld [vmem:[#allocation11 + $0xa0] sm:$0xff] }
 0x1a1   :  { %v1060_v61 = vpop.f32.mrf.mxu0  ;;  %v1101_v63 = vpop.f32.mrf.mxu1  ;;  %v3615_v50 = vcombine.low %v1835_v30, %v1839_v31  ;;  %v3606_v51 = vcombine.high %v1826_v36, %v1830_v46  ;;  %v3608_v52 = vcombine.high %v1827_v47, %v1831_v48  ;;  %v3605_v53 = vcombine.low %v1826_v36, %v1830_v46 }
 0x1a2   :  { %v1109_v62 = vmax.f32 %v1059_v55, 0.0  ;;  %v1111_v0 = vmax.f32 %v1100_v60, 0.0  ;;  %v1118_v2 = vpack.c.bf16 %v1110_v59, %v1110_v59  ;;  %v1116_v5 = vpack.c.bf16 %v1108_v58, %v1108_v58  ;;  %v1818_v55 = vld [vmem:[#allocation11 + $0x80] sm:$0xff]  ;;  %v1819_v58 = vld [vmem:[#allocation11 + $0x88] sm:$0xff] }
 0x1a3   :  { %v1061_v1 = vpop.f32.mrf.mxu0  ;;  %v1102_v4 = vpop.f32.mrf.mxu1  ;;  %v3607_v54 = vcombine.low %v1827_v47, %v1831_v48  ;;  %v3598_v59 = vcombine.high %v1818_v55, %v1822_v56  ;;  %v1823_v60 = vld [vmem:[#allocation11 + $0xa8] sm:$0xff]  ;;  %v3597_v61 = vcombine.low %v1818_v55, %v1822_v56 }
 0x1a4   :  { %v1117_v3 = vpack.c.bf16 %v1109_v62, %v1109_v62  ;;  %v1119_v6 = vpack.c.bf16 %v1111_v0, %v1111_v0  ;;  %v3599_v62 = vcombine.low %v1819_v58, %v1823_v60  ;;  %v3600_v63 = vcombine.high %v1819_v58, %v1823_v60  ;;  %v1810_v0 = vld [vmem:[#allocation11 + $0x40] sm:$0xff]  ;;  %v1815_v4 = vld [vmem:[#allocation11 + $0x68] sm:$0xff]  ;;  %v1856_v60 = vld [vmem:[#allocation11 + $0x1b0] sm:$0xff] }
 0x1a5   :  { %v1814_v1 = vld [vmem:[#allocation11 + $0x60] sm:$0xff] }
 0x1a6   :  { %1751 = vmatprep.mubr.bf16.mxu0 %v1117_v3  ;;  %1791 = vmatprep.mubr.bf16.mxu1 %v1119_v6  ;;  %v3590_v3 = vcombine.high %v1810_v0, %v1814_v1 }
 0x1a7   :  { %1752 = vmatmul.mubr.bf16.vlgmr.msra.gmra.mxu0 %v1116_v5  ;;  %1792 = vmatmul.mubr.bf16.vlgmr.msra.gmra.mxu1 %v1118_v2  ;;  %v1811_v2 = vld [vmem:[#allocation11 + $0x48] sm:$0xff]  ;;  %v3589_v5 = vcombine.low %v1810_v0, %v1814_v1 }
 0x1a8   :  { %2229 = vmatpush1.bf16.msra.mxu0 %v3637_v9  ;;  %2270 = vmatpush1.bf16.msra.mxu1 %v3639_v15  ;;  %v3591_v6 = vcombine.low %v1811_v2, %v1815_v4  ;;  %v3592_v57 = vcombine.high %v1811_v2, %v1815_v4  ;;  %v1803_v9 = vld [vmem:[#allocation11 + $0x8] sm:$0xff]  ;;  %v1848_v4 = vld [vmem:[#allocation11 + $0x170] sm:$0xff] }
 0x1a9   :  { %2230 = vmatprep.subr.bf16.mxu0 %v3630_v17  ;;  %2271 = vmatprep.subr.bf16.mxu1 %v3632_v21  ;;  %v3583_v14 = vcombine.low %v1803_v9, %v1807_v11  ;;  %v3584_v15 = vcombine.high %v1803_v9, %v1807_v11  ;;  %v1864_v17 = vld [vmem:[#allocation11 + $0x1f0] sm:$0xff]  ;;  %v1865_v21 = vld [vmem:[#allocation11 + $0x1f8] sm:$0xff] }
 0x1aa   :  { %v3641_v19 = vcombine.low %v1860_v16, %v1864_v17  ;;  %v3642_v20 = vcombine.high %v1860_v16, %v1864_v17  ;;  %2260 = vmatprep.mubr.bf16.mxu0 %v4338_v13  ;;  %2301 = vmatprep.mubr.bf16.mxu1 %v4338_v13  ;;  %v3643_v22 = vcombine.low %v1861_v18, %v1865_v21  ;;  %v1840_v11 = vld [vmem:[#allocation11 + $0x130] sm:$0xff] }
 0x1ab   :  { %v3644_v23 = vcombine.high %v1861_v18, %v1865_v21  ;;  %v1829_v21 = vld [vmem:[#allocation11 + $0xd8] sm:$0xff] }
 0x1ac   :  { %2231 = vmatpush1.bf16.msra.mxu0 %v3629_v24  ;;  %2272 = vmatpush1.bf16.msra.mxu1 %v3631_v25 }
 0x1ad   :  { %2232 = vmatprep.subr.bf16.mxu0 %v3622_v26  ;;  %2273 = vmatprep.subr.bf16.mxu1 %v3624_v27 }
 0x1b0   :  { %2233 = vmatpush1.bf16.msra.mxu0 %v3621_v32  ;;  %2274 = vmatpush1.bf16.msra.mxu1 %v3623_v33  ;;  %v3516_v33 = vld [vmem:[#allocation10] ss:$0 sm:$0xff] }
 0x1b1   :  { %2234 = vmatprep.subr.bf16.mxu0 %v3614_v34  ;;  %2275 = vmatprep.subr.bf16.mxu1 %v3616_v35 }
 0x1b4   :  { %2235 = vmatpush1.bf16.msra.mxu0 %v3613_v49  ;;  %2276 = vmatpush1.bf16.msra.mxu1 %v3615_v50 }
 0x1b5   :  { %2236 = vmatprep.subr.bf16.mxu0 %v3606_v51  ;;  %2277 = vmatprep.subr.bf16.mxu1 %v3608_v52 }
 0x1b8   :  { %2237 = vmatpush1.bf16.msra.mxu0 %v3605_v53  ;;  %2278 = vmatpush1.bf16.msra.mxu1 %v3607_v54 }
 0x1b9   :  { %2238 = vmatprep.subr.bf16.mxu0 %v3598_v59  ;;  %2279 = vmatprep.subr.bf16.mxu1 %v3600_v63  ;;  %v1852_v59 = vld [vmem:[#allocation11 + $0x190] sm:$0xff] }
 0x1ba   :  { %v3634_v1 = vcombine.high %v1852_v59, %v1856_v60 }
 0x1bc   :  { %2239 = vmatpush1.bf16.msra.mxu0 %v3597_v61  ;;  %2280 = vmatpush1.bf16.msra.mxu1 %v3599_v62  ;;  %v1853_v61 = vld [vmem:[#allocation11 + $0x198] sm:$0xff] }
 0x1bd   :  { %2240 = vmatprep.subr.bf16.mxu0 %v3590_v3  ;;  %2281 = vmatprep.subr.bf16.mxu1 %v3592_v57  ;;  %v1857_v62 = vld [vmem:[#allocation11 + $0x1b8] sm:$0xff]  ;;  %v1844_v3 = vld [vmem:[#allocation11 + $0x150] sm:$0xff]  ;;  %v3633_v57 = vcombine.low %v1852_v59, %v1856_v60 }
 0x1be   :  { %v3636_v2 = vcombine.high %v1853_v61, %v1857_v62  ;;  %v3635_v7 = vcombine.low %v1853_v61, %v1857_v62  ;;  %v3626_v8 = vcombine.high %v1844_v3, %v1848_v4  ;;  %v3943_v62 = vld [vmem:[#allocation13 + $0x74] ss:$8 sps:$4 sm:$0xff]  }
 0x1c0   :  { %2241 = vmatpush1.bf16.msra.mxu0 %v3589_v5  ;;  %2282 = vmatpush1.bf16.msra.mxu1 %v3591_v6  ;;  %v1845_v5 = vld [vmem:[#allocation11 + $0x158] sm:$0xff] }
 0x1c1   :  { %2242 = vmatprep.subr.bf16.mxu0 %v3582_v10  ;;  %2283 = vmatprep.subr.bf16.mxu1 %v3584_v15  ;;  %v1849_v6 = vld [vmem:[#allocation11 + $0x178] sm:$0xff]  ;;  %v1836_v10 = vld [vmem:[#allocation11 + $0x110] sm:$0xff]  ;;  %v3625_v15 = vcombine.low %v1844_v3, %v1848_v4  ;;  %v3949_v3 = vld [vmem:[#allocation13 + $0x64] ss:$8 sps:$4 sm:$0xff]  }
 0x1c2   :  { %v3628_v9 = vcombine.high %v1845_v5, %v1849_v6  ;;  %v3627_v16 = vcombine.low %v1845_v5, %v1849_v6  ;;  %v3618_v17 = vcombine.high %v1836_v10, %v1840_v11  ;;  %v3952_v4 = vld [vmem:[#allocation13 + $0x164] ss:$8 sps:$4 sm:$0xff]   ;;  %v3947_v5 = vld [vmem:[#allocation13 + $0x60] ss:$8 sps:$4 sm:$0xff]  }
 0x1c3   :  { %v3950_v6 = vld [vmem:[#allocation13 + $0x160] ss:$8 sps:$4 sm:$0xff]  }
 0x1c4   :  { %2243 = vmatpush1.bf16.msra.mxu0 %v3581_v12  ;;  %2284 = vmatpush1.bf16.msra.mxu1 %v3583_v14  ;;  %v1837_v12 = vld [vmem:[#allocation11 + $0x118] sm:$0xff] }
 0x1c5   :  { %2310 = vmatprep.subr.bf16.mxu0 %v3642_v20  ;;  %2351 = vmatprep.subr.bf16.mxu1 %v3644_v23  ;;  %v1841_v14 = vld [vmem:[#allocation11 + $0x138] sm:$0xff]  ;;  %v1832_v20 = vld [vmem:[#allocation11 + $0xf0] sm:$0xff]  ;;  %v3617_v23 = vcombine.low %v1836_v10, %v1840_v11  ;;  %v3961_v10 = vld [vmem:[#allocation13 + $0x44] ss:$8 sps:$4 sm:$0xff]  }
 0x1c6   :  { %v3620_v18 = vcombine.high %v1837_v12, %v1841_v14  ;;  %v3964_v11 = vld [vmem:[#allocation13 + $0x144] ss:$8 sps:$4 sm:$0xff]  }
 0x227   :  { %v3789_v24 = vpop.f32.mrf.mxu0  ;;  %v3811_v25 = vpop.f32.mrf.mxu1 }
 0x229   :  { %v3790_v26 = vpop.f32.mrf.mxu0  ;;  %v3812_v27 = vpop.f32.mrf.mxu1 }
 0x22a   :  { %v3791_v32 = vadd.f32 %v3790_v26, %v3789_v24  ;;  %v3813_v36 = vadd.f32 %v3812_v27, %v3811_v25  ;;  %v3619_v24 = vcombine.low %v1837_v12, %v1841_v14  ;;  %v1820_v26 = vld [vmem:[#allocation11 + $0x90] sm:$0xff]  ;;  %v3959_v12 = vld [vmem:[#allocation13 + $0x40] ss:$8 sps:$4 sm:$0xff]  }
 0x22b   :  { %v3792_v28 = vpop.f32.mrf.mxu0  ;;  %v3814_v29 = vpop.f32.mrf.mxu1  ;;  %v1824_v27 = vld [vmem:[#allocation11 + $0xb0] sm:$0xff] }
 0x22c   :  { %v1674_v34 = vadd.f32 %v3791_v32, %v3516_v33  ;;  %v1821_v28 = vld [vmem:[#allocation11 + $0x98] sm:$0xff]  ;;  %v3602_v32 = vcombine.high %v1820_v26, %v1824_v27 }
 0x22d   :  { %v3793_v30 = vpop.f32.mrf.mxu0  ;;  %v3815_v31 = vpop.f32.mrf.mxu1  ;;  %v1825_v29 = vld [vmem:[#allocation11 + $0xb8] sm:$0xff] }
 0x22e   :  { %v1714_v48 = vadd.f32 %v3813_v36, %v1674_v34  ;;  %v3604_v33 = vcombine.high %v1821_v28, %v1825_v29  ;;  %v1812_v34 = vld [vmem:[#allocation11 + $0x50] sm:$0xff]  ;;  %v1813_v36 = vld [vmem:[#allocation11 + $0x58] sm:$0xff] }
 0x22f   :  { %v3967_v14 = vld [vmem:[#allocation13 + $0x34] ss:$8 sps:$4 sm:$0xff]  }
 0x267   :  { %v3833_v35 = vpop.f32.mrf.mxu0  ;;  %v3855_v46 = vpop.f32.mrf.mxu1 }
 0x269   :  { %v3834_v47 = vpop.f32.mrf.mxu0  ;;  %v3856_v50 = vpop.f32.mrf.mxu1 }
 0x26a   :  { %v3835_v49 = vadd.f32 %v3834_v47, %v3833_v35  ;;  %v3857_v53 = vadd.f32 %v3856_v50, %v3855_v46  ;;  %v1816_v35 = vld [vmem:[#allocation11 + $0x70] sm:$0xff]  ;;  %v1817_v46 = vld [vmem:[#allocation11 + $0x78] sm:$0xff]  ;;  %v3601_v47 = vcombine.low %v1820_v26, %v1824_v27  ;;  %v3988_v26 = vld [vmem:[#allocation13 + $0x104] ss:$8 sps:$4 sm:$0xff]  }
 0x26b   :  { %v3836_v51 = vpop.f32.mrf.mxu0  ;;  %v3858_v54 = vpop.f32.mrf.mxu1  ;;  %v3596_v50 = vcombine.high %v1813_v36, %v1817_v46  ;;  %v3983_v27 = vld [vmem:[#allocation13] ss:$8 sps:$4 sm:$0xff]  }
 0x26c   :  { %v1754_v52 = vadd.f32 %v3835_v49, %v1714_v48  ;;  %v3603_v48 = vcombine.low %v1821_v28, %v1825_v29  ;;  %v3594_v49 = vcombine.high %v1812_v34, %v1816_v35  ;;  %v1804_v51 = vld [vmem:[#allocation11 + $0x10] sm:$0xff]  ;;  %v1809_v54 = vld [vmem:[#allocation11 + $0x38] sm:$0xff]  ;;  %v3986_v28 = vld [vmem:[#allocation13 + $0x100] ss:$8 sps:$4 sm:$0xff]  }
 0x26d   :  { %v3837_v55 = vpop.f32.mrf.mxu0  ;;  %v3859_v58 = vpop.f32.mrf.mxu1  ;;  %v3991_v29 = vld [vmem:[#allocation13 + $0xf4] ss:$8 sps:$4 sm:$0xff]  }
 0x26e   :  { %v1794_v56 = vadd.f32 %v3857_v53, %v1754_v52  ;;  %v1808_v52 = vld [vmem:[#allocation11 + $0x30] sm:$0xff]  ;;  %v1805_v53 = vld [vmem:[#allocation11 + $0x18] sm:$0xff]  ;;  %v3593_v55 = vcombine.low %v1812_v34, %v1816_v35  ;;  %v4000_v34 = vld [vmem:[#allocation13 + $0x1e4] ss:$8 sps:$4 sm:$0xff]  }
 0x26f   :  { %v3586_v58 = vcombine.high %v1804_v51, %v1808_v52  ;;  %v3588_v59 = vcombine.high %v1805_v53, %v1809_v54  ;;  %v3585_v60 = vcombine.low %v1804_v51, %v1808_v52  ;;  %v3587_v61 = vcombine.low %v1805_v53, %v1809_v54  ;;  %v3995_v35 = vld [vmem:[#allocation13 + $0xe0] ss:$8 sps:$4 sm:$0xff]   ;;  %v4012_v51 = vld [vmem:[#allocation13 + $0x1c4] ss:$8 sps:$4 sm:$0xff]   ;;  %v4015_v54 = vld [vmem:[#allocation13 + $0xb4] ss:$8 sps:$4 sm:$0xff]  }
 0x270   :  { %v1799_v63 = vmax.f32 %v1794_v56, 0.0  ;;  %v3595_v56 = vcombine.low %v1813_v36, %v1817_v46  ;;  %v3998_v36 = vld [vmem:[#allocation13 + $0x1e0] ss:$8 sps:$4 sm:$0xff]   ;;  %v4003_v46 = vld [vmem:[#allocation13 + $0xd4] ss:$8 sps:$4 sm:$0xff]  }
 0x271   :  { %v4007_v52 = vld [vmem:[#allocation13 + $0xc0] ss:$8 sps:$4 sm:$0xff]  }
 0x272   :  { %v4473_v0 = vpack.c.bf16 %v1799_v63, %v1799_v63  ;;  %1800 = vst [vmem:[#allocation15] sm:$0xff] %v1799_v63  ;;  %v3946_v63 = vld [vmem:[#allocation13 + $0x174] ss:$8 sps:$4 sm:$0xff]   ;;  %v4010_v53 = vld [vmem:[#allocation13 + $0x1c0] ss:$8 sps:$4 sm:$0xff]  }
 0x274   :  { %2261 = vmatmul.mubr.bf16.vlgmr.msra.gmra.mxu0 %v4473_v0  ;;  %2302 = vmatmul.mubr.bf16.vlgmr.msra.gmra.mxu1 %v4473_v0 }
 0x275   :  { %2311 = vmatpush1.bf16.msra.mxu0 %v3641_v19  ;;  %2352 = vmatpush1.bf16.msra.mxu1 %v3643_v22  ;;  %v1828_v19 = vld [vmem:[#allocation11 + $0xd0] sm:$0xff]  ;;  %v1833_v22 = vld [vmem:[#allocation11 + $0xf8] sm:$0xff] }
 0x276   :  { %2312 = vmatprep.subr.bf16.mxu0 %v3634_v1  ;;  %2353 = vmatprep.subr.bf16.mxu1 %v3636_v2  ;;  %v3610_v25 = vcombine.high %v1828_v19, %v1832_v20  ;;  %v3609_v30 = vcombine.low %v1828_v19, %v1832_v20  ;;  %v3611_v31 = vcombine.low %v1829_v21, %v1833_v22  ;;  %v3941_v1 = vld [vmem:[#allocation13 + $0x70] ss:$8 sps:$4 sm:$0xff]   ;;  %v3976_v19 = vld [vmem:[#allocation13 + $0x124] ss:$8 sps:$4 sm:$0xff]   ;;  %v3971_v20 = vld [vmem:[#allocation13 + $0x20] ss:$8 sps:$4 sm:$0xff]  }
 0x277   :  { %2342 = vmatprep.mubr.bf16.mxu0 %v4338_v13  ;;  %2383 = vmatprep.mubr.bf16.mxu1 %v4338_v13  ;;  %v3612_v13 = vcombine.high %v1829_v21, %v1833_v22  ;;  %v3944_v2 = vld [vmem:[#allocation13 + $0x170] ss:$8 sps:$4 sm:$0xff]   ;;  %v3974_v21 = vld [vmem:[#allocation13 + $0x120] ss:$8 sps:$4 sm:$0xff]   ;;  %v3979_v22 = vld [vmem:[#allocation13 + $0x14] ss:$8 sps:$4 sm:$0xff]  }
 0x279   :  { %2313 = vmatpush1.bf16.msra.mxu0 %v3633_v57  ;;  %2354 = vmatpush1.bf16.msra.mxu1 %v3635_v7  ;;  %v3955_v57 = vld [vmem:[#allocation13 + $0x54] ss:$8 sps:$4 sm:$0xff]  }
 0x27a   :  { %2314 = vmatprep.subr.bf16.mxu0 %v3626_v8  ;;  %2355 = vmatprep.subr.bf16.mxu1 %v3628_v9  ;;  %v3958_v7 = vld [vmem:[#allocation13 + $0x154] ss:$8 sps:$4 sm:$0xff]   ;;  %v3953_v8 = vld [vmem:[#allocation13 + $0x50] ss:$8 sps:$4 sm:$0xff]  }
 0x27b   :  { %v3956_v9 = vld [vmem:[#allocation13 + $0x150] ss:$8 sps:$4 sm:$0xff]  }
 0x27d   :  { %2315 = vmatpush1.bf16.msra.mxu0 %v3625_v15  ;;  %2356 = vmatpush1.bf16.msra.mxu1 %v3627_v16  ;;  %v3970_v15 = vld [vmem:[#allocation13 + $0x134] ss:$8 sps:$4 sm:$0xff]   ;;  %v3965_v16 = vld [vmem:[#allocation13 + $0x30] ss:$8 sps:$4 sm:$0xff]  }
 0x27e   :  { %2316 = vmatprep.subr.bf16.mxu0 %v3618_v17  ;;  %2357 = vmatprep.subr.bf16.mxu1 %v3620_v18  ;;  %v3968_v17 = vld [vmem:[#allocation13 + $0x130] ss:$8 sps:$4 sm:$0xff]   ;;  %v3973_v18 = vld [vmem:[#allocation13 + $0x24] ss:$8 sps:$4 sm:$0xff]  }
 0x281   :  { %2317 = vmatpush1.bf16.msra.mxu0 %v3617_v23  ;;  %2358 = vmatpush1.bf16.msra.mxu1 %v3619_v24  ;;  %v3982_v23 = vld [vmem:[#allocation13 + $0x114] ss:$8 sps:$4 sm:$0xff]   ;;  %v3977_v24 = vld [vmem:[#allocation13 + $0x10] ss:$8 sps:$4 sm:$0xff]  }
 0x282   :  { %2318 = vmatprep.subr.bf16.mxu0 %v3610_v25  ;;  %2359 = vmatprep.subr.bf16.mxu1 %v3612_v13  ;;  %v3980_v25 = vld [vmem:[#allocation13 + $0x110] ss:$8 sps:$4 sm:$0xff]   ;;  %v3985_v13 = vld [vmem:[#allocation13 + $0x4] ss:$8 sps:$4 sm:$0xff]  }
 0x285   :  { %2319 = vmatpush1.bf16.msra.mxu0 %v3609_v30  ;;  %2360 = vmatpush1.bf16.msra.mxu1 %v3611_v31  ;;  %v3994_v30 = vld [vmem:[#allocation13 + $0x1f4] ss:$8 sps:$4 sm:$0xff]   ;;  %v3989_v31 = vld [vmem:[#allocation13 + $0xf0] ss:$8 sps:$4 sm:$0xff]  }
 0x286   :  { %2320 = vmatprep.subr.bf16.mxu0 %v3602_v32  ;;  %2361 = vmatprep.subr.bf16.mxu1 %v3604_v33  ;;  %v3992_v32 = vld [vmem:[#allocation13 + $0x1f0] ss:$8 sps:$4 sm:$0xff]   ;;  %v3997_v33 = vld [vmem:[#allocation13 + $0xe4] ss:$8 sps:$4 sm:$0xff]  }
 0x289   :  { %2321 = vmatpush1.bf16.msra.mxu0 %v3601_v47  ;;  %2362 = vmatpush1.bf16.msra.mxu1 %v3603_v48  ;;  %v4006_v47 = vld [vmem:[#allocation13 + $0x1d4] ss:$8 sps:$4 sm:$0xff]   ;;  %v4001_v48 = vld [vmem:[#allocation13 + $0xd0] ss:$8 sps:$4 sm:$0xff]  }
 0x28a   :  { %2322 = vmatprep.subr.bf16.mxu0 %v3594_v49  ;;  %2363 = vmatprep.subr.bf16.mxu1 %v3596_v50  ;;  %v4004_v49 = vld [vmem:[#allocation13 + $0x1d0] ss:$8 sps:$4 sm:$0xff]   ;;  %v4009_v50 = vld [vmem:[#allocation13 + $0xc4] ss:$8 sps:$4 sm:$0xff]  }
 0x28d   :  { %2323 = vmatpush1.bf16.msra.mxu0 %v3593_v55  ;;  %2364 = vmatpush1.bf16.msra.mxu1 %v3595_v56  ;;  %v4018_v55 = vld [vmem:[#allocation13 + $0x1b4] ss:$8 sps:$4 sm:$0xff]   ;;  %v4013_v56 = vld [vmem:[#allocation13 + $0xb0] ss:$8 sps:$4 sm:$0xff]  }
 0x28e   :  { %2324 = vmatprep.subr.bf16.mxu0 %v3586_v58  ;;  %2365 = vmatprep.subr.bf16.mxu1 %v3588_v59  ;;  %v4016_v58 = vld [vmem:[#allocation13 + $0x1b0] ss:$8 sps:$4 sm:$0xff]   ;;  %v4021_v59 = vld [vmem:[#allocation13 + $0xa4] ss:$8 sps:$4 sm:$0xff]  }
 0x291   :  { %2325 = vmatpush1.bf16.msra.mxu0 %v3585_v60  ;;  %2366 = vmatpush1.bf16.msra.mxu1 %v3587_v61  ;;  %v4024_v60 = vld [vmem:[#allocation13 + $0x1a4] ss:$8 sps:$4 sm:$0xff]   ;;  %v4019_v61 = vld [vmem:[#allocation13 + $0xa0] ss:$8 sps:$4 sm:$0xff]  }
 0x292   :  { %3188 = vmatprep.subr.bf16.mxu0 %v3943_v62  ;;  %3229 = vmatprep.subr.bf16.mxu1 %v3946_v63  ;;  %v4022_v62 = vld [vmem:[#allocation13 + $0x1a0] ss:$8 sps:$4 sm:$0xff]   ;;  %v4027_v63 = vld [vmem:[#allocation13 + $0x94] ss:$8 sps:$4 sm:$0xff]  }
 0x294   :  { %2343 = vmatmul.mubr.bf16.vlgmr.msra.gmra.mxu0 %v4473_v0  ;;  %2384 = vmatmul.mubr.bf16.vlgmr.msra.gmra.mxu1 %v4473_v0  ;;  %v3962_v0 = vld [vmem:[#allocation13 + $0x140] ss:$8 sps:$4 sm:$0xff]  }
 0x295   :  { %3189 = vmatpush1.bf16.msra.mxu0 %v3941_v1  ;;  %3230 = vmatpush1.bf16.msra.mxu1 %v3944_v2  ;;  %v4030_v1 = vld [vmem:[#allocation13 + $0x194] ss:$8 sps:$4 sm:$0xff]   ;;  %v4025_v2 = vld [vmem:[#allocation13 + $0x90] ss:$8 sps:$4 sm:$0xff]  }
 0x296   :  { %3190 = vmatprep.subr.bf16.mxu0 %v3949_v3  ;;  %3231 = vmatprep.subr.bf16.mxu1 %v3952_v4  ;;  %v4028_v3 = vld [vmem:[#allocation13 + $0x190] ss:$8 sps:$4 sm:$0xff]   ;;  %v4033_v4 = vld [vmem:[#allocation13 + $0x84] ss:$8 sps:$4 sm:$0xff]  }
 0x299   :  { %3191 = vmatpush1.bf16.msra.mxu0 %v3947_v5  ;;  %3232 = vmatpush1.bf16.msra.mxu1 %v3950_v6  ;;  %v4036_v5 = vld [vmem:[#allocation13 + $0x184] ss:$8 sps:$4 sm:$0xff]   ;;  %v4031_v6 = vld [vmem:[#allocation13 + $0x80] ss:$8 sps:$4 sm:$0xff]  }
 0x29a   :  { %3192 = vmatprep.subr.bf16.mxu0 %v3955_v57  ;;  %3233 = vmatprep.subr.bf16.mxu1 %v3958_v7  ;;  %v4034_v57 = vld [vmem:[#allocation13 + $0x180] ss:$8 sps:$4 sm:$0xff]   ;;  %v4039_v7 = vld [vmem:[#allocation13 + $0x274] ss:$8 sps:$4 sm:$0xff]  }
 0x29d   :  { %3193 = vmatpush1.bf16.msra.mxu0 %v3953_v8  ;;  %3234 = vmatpush1.bf16.msra.mxu1 %v3956_v9  ;;  %v4042_v8 = vld [vmem:[#allocation13 + $0x374] ss:$8 sps:$4 sm:$0xff]   ;;  %v4482_v9 = vld [vmem:[%s4529_s6] sm:$0xff]  ;;  %s4339_s6 = smov [#allocation15]  }
 0x29e   :  { %3194 = vmatprep.subr.bf16.mxu0 %v3961_v10  ;;  %3235 = vmatprep.subr.bf16.mxu1 %v3964_v11  ;;  %v1871_v10 = vrot.slane %v4482_v9, %v4438_v42  ;;  %v1879_v11 = vrot.slane %v4482_v9, %v270_v43  ;;  %s3372_s1 = sshll.u32 %s4339_s6, 4  ;;  %s3373_s1 = int_to_ptr.vmem [resolvable:$true] %s3372_s1 }
 0x29f   :  { %s4273_s30 = scalar_lea.vmem %s3373_s1, 128  ;;  %p4278_p8 = scmp.lt.s32.totalorder %s3373_s1, %s3373_s1 }
 0x2a0   :  { %p4274_p7 = scmp.ne.s32.totalorder %s3373_s1, %s4273_s30  ;;  %p4279_p9 = scmp.lt.s32.totalorder %s4273_s30, %s4273_s30 }
 0x2a1   :  { %3195 = vmatpush1.bf16.msra.mxu0 %v3959_v12  ;;  %3236 = vmatpush1.bf16.msra.mxu1 %v3962_v0  ;;  %v1875_v12 = vrot.slane %v4482_v9, %v4444_v44  ;;  %v1883_v0 = vrot.slane %v4482_v9, %v274_v45  ;;  %v4040_v45 = vld [vmem:[#allocation13 + $0x370] ss:$8 sps:$4 sm:$0xff]  }
 0x2a2   :  { %3196 = vmatprep.subr.bf16.mxu0 %v3967_v14  ;;  %3237 = vmatprep.subr.bf16.mxu1 %v3970_v15  ;;  %p4280_p10 = por %p4279_p9, %p4278_p8 }
 0x2a4   :  { %p4281_p11 = pnand %p4280_p10, %p4274_p7 }
 0x2a5   :  { %3197 = vmatpush1.bf16.msra.mxu0 %v3965_v16  ;;  %3238 = vmatpush1.bf16.msra.mxu1 %v3968_v17 }
 0x2a6   :  { %3198 = vmatprep.subr.bf16.mxu0 %v3973_v18  ;;  %3239 = vmatprep.subr.bf16.mxu1 %v3976_v19 }
 0x2a9   :  { %3199 = vmatpush1.bf16.msra.mxu0 %v3971_v20  ;;  %3240 = vmatpush1.bf16.msra.mxu1 %v3974_v21 }
 0x2aa   :  { %3200 = vmatprep.subr.bf16.mxu0 %v3979_v22  ;;  %3241 = vmatprep.subr.bf16.mxu1 %v3982_v23 }
 0x2ad   :  { %3201 = vmatpush1.bf16.msra.mxu0 %v3977_v24  ;;  %3242 = vmatpush1.bf16.msra.mxu1 %v3980_v25 }
 0x2ae   :  { %3202 = vmatprep.subr.bf16.mxu0 %v3985_v13  ;;  %3243 = vmatprep.subr.bf16.mxu1 %v3988_v26 }
 0x2b1   :  { %3203 = vmatpush1.bf16.msra.mxu0 %v3983_v27  ;;  %3244 = vmatpush1.bf16.msra.mxu1 %v3986_v28 }
 0x2b2   :  { %3204 = vmatprep.subr.bf16.mxu0 %v3991_v29  ;;  %3245 = vmatprep.subr.bf16.mxu1 %v3994_v30  ;;  %v4037_v30 = vld [vmem:[#allocation13 + $0x270] ss:$8 sps:$4 sm:$0xff]  }
 0x2b5   :  { %3205 = vmatpush2.bf16.msra.mxu0 %v3989_v31  ;;  %3246 = vmatpush2.bf16.msra.mxu1 %v3992_v32 }
 0x2b6   :  { %3206 = vmatprep.subr.bf16.mxu0 %v3997_v33  ;;  %3247 = vmatprep.subr.bf16.mxu1 %v4000_v34  ;;  %v4045_v33 = vld [vmem:[#allocation13 + $0x264] ss:$8 sps:$4 sm:$0xff]  }
 0x2b7   :  { %v4048_v34 = vld [vmem:[#allocation13 + $0x364] ss:$8 sps:$4 sm:$0xff]  }
 0x2b9   :  { %3207 = vmatpush2.bf16.msra.mxu0 %v3995_v35  ;;  %3248 = vmatpush2.bf16.msra.mxu1 %v3998_v36  ;;  %v4043_v35 = vld [vmem:[#allocation13 + $0x260] ss:$8 sps:$4 sm:$0xff]  }
 0x2ba   :  { %3208 = vmatprep.subr.bf16.mxu0 %v4003_v46  ;;  %3249 = vmatprep.subr.bf16.mxu1 %v4006_v47  ;;  %v4046_v36 = vld [vmem:[#allocation13 + $0x360] ss:$8 sps:$4 sm:$0xff]   ;;  %v4051_v46 = vld [vmem:[#allocation13 + $0x254] ss:$8 sps:$4 sm:$0xff]  }
 0x2bb   :  { %v4054_v47 = vld [vmem:[#allocation13 + $0x354] ss:$8 sps:$4 sm:$0xff]  }
 0x2bd   :  { %3209 = vmatpush2.bf16.msra.mxu0 %v4001_v48  ;;  %3250 = vmatpush2.bf16.msra.mxu1 %v4004_v49  ;;  %v4049_v48 = vld [vmem:[#allocation13 + $0x250] ss:$8 sps:$4 sm:$0xff]  }
 0x2be   :  { %3210 = vmatprep.subr.bf16.mxu0 %v4009_v50  ;;  %3251 = vmatprep.subr.bf16.mxu1 %v4012_v51  ;;  %v4052_v49 = vld [vmem:[#allocation13 + $0x350] ss:$8 sps:$4 sm:$0xff]   ;;  %v4057_v50 = vld [vmem:[#allocation13 + $0x244] ss:$8 sps:$4 sm:$0xff]  }
 0x2bf   :  { %v4060_v51 = vld [vmem:[#allocation13 + $0x344] ss:$8 sps:$4 sm:$0xff]  }
 0x2c1   :  { %3211 = vmatpush2.bf16.msra.mxu0 %v4007_v52  ;;  %3252 = vmatpush2.bf16.msra.mxu1 %v4010_v53  ;;  %v4055_v52 = vld [vmem:[#allocation13 + $0x240] ss:$8 sps:$4 sm:$0xff]  }
 0x2c2   :  { %3212 = vmatprep.subr.bf16.mxu0 %v4015_v54  ;;  %3253 = vmatprep.subr.bf16.mxu1 %v4018_v55  ;;  %v4058_v53 = vld [vmem:[#allocation13 + $0x340] ss:$8 sps:$4 sm:$0xff]   ;;  %v4063_v54 = vld [vmem:[#allocation13 + $0x234] ss:$8 sps:$4 sm:$0xff]  }
 0x2c3   :  { %v4066_v55 = vld [vmem:[#allocation13 + $0x334] ss:$8 sps:$4 sm:$0xff]  }
 0x2c5   :  { %3213 = vmatpush2.bf16.msra.mxu0 %v4013_v56  ;;  %3254 = vmatpush2.bf16.msra.mxu1 %v4016_v58  ;;  %v4061_v56 = vld [vmem:[#allocation13 + $0x230] ss:$8 sps:$4 sm:$0xff]  }
 0x2c6   :  { %3214 = vmatprep.subr.bf16.mxu0 %v4021_v59  ;;  %3255 = vmatprep.subr.bf16.mxu1 %v4024_v60  ;;  %v4064_v58 = vld [vmem:[#allocation13 + $0x330] ss:$8 sps:$4 sm:$0xff]   ;;  %v4069_v59 = vld [vmem:[#allocation13 + $0x224] ss:$8 sps:$4 sm:$0xff]  }
 0x2c7   :  { %v4072_v60 = vld [vmem:[#allocation13 + $0x324] ss:$8 sps:$4 sm:$0xff]  }
 0x2c9   :  { %3215 = vmatpush2.bf16.msra.mxu0 %v4019_v61  ;;  %3256 = vmatpush2.bf16.msra.mxu1 %v4022_v62  ;;  %v4067_v61 = vld [vmem:[#allocation13 + $0x220] ss:$8 sps:$4 sm:$0xff]  }
 0x2ca   :  { %3216 = vmatprep.subr.bf16.mxu0 %v4027_v63  ;;  %3257 = vmatprep.subr.bf16.mxu1 %v4030_v1  ;;  %v4070_v62 = vld [vmem:[#allocation13 + $0x320] ss:$8 sps:$4 sm:$0xff]   ;;  %v4075_v63 = vld [vmem:[#allocation13 + $0x214] ss:$8 sps:$4 sm:$0xff]  }
 0x2cb   :  { %v4078_v1 = vld [vmem:[#allocation13 + $0x314] ss:$8 sps:$4 sm:$0xff]  }
 0x2cd   :  { %3217 = vmatpush2.bf16.msra.mxu0 %v4025_v2  ;;  %3258 = vmatpush2.bf16.msra.mxu1 %v4028_v3  ;;  %v1891_v2 = vrot.slane %v4482_v9, %v282_v39  ;;  %v1899_v3 = vrot.slane %v4482_v9, %v290_v40  ;;  %v4079_v39 = vld [vmem:[#allocation13 + $0x200] ss:$8 sps:$4 sm:$0xff]  }
 0x2ce   :  { %3218 = vmatprep.subr.bf16.mxu0 %v4033_v4  ;;  %3259 = vmatprep.subr.bf16.mxu1 %v4036_v5  ;;  %v4073_v4 = vld [vmem:[#allocation13 + $0x210] ss:$8 sps:$4 sm:$0xff]  }
 0x2cf   :  { %v4076_v5 = vld [vmem:[#allocation13 + $0x310] ss:$8 sps:$4 sm:$0xff]  }
 0x2d1   :  { %3219 = vmatpush2.bf16.msra.mxu0 %v4031_v6  ;;  %3260 = vmatpush2.bf16.msra.mxu1 %v4034_v57 }
 0x2d2   :  { %3270 = vmatprep.subr.bf16.mxu0 %v4039_v7  ;;  %3311 = vmatprep.subr.bf16.mxu1 %v4042_v8  ;;  %v4081_v7 = vld [vmem:[#allocation13 + $0x204] ss:$8 sps:$4 sm:$0xff]  }
 0x2d3   :  { %v4084_v8 = vld [vmem:[#allocation13 + $0x304] ss:$8 sps:$4 sm:$0xff]  }
 0x334   :  { %v2262_v14 = vpop.f32.mrf.mxu0  ;;  %v2303_v15 = vpop.f32.mrf.mxu1 }
 0x335   :  { %v2263_v16 = vadd.f32 %v2262_v14, %v1871_v10  ;;  %v2304_v17 = vadd.f32 %v2303_v15, %v1879_v11  ;;  %v4082_v14 = vld [vmem:[#allocation13 + $0x300] ss:$8 sps:$4 sm:$0xff]  }
 0x336   :  { %v2264_v18 = vpop.f32.mrf.mxu0  ;;  %v2305_v19 = vpop.f32.mrf.mxu1 }
 0x337   :  { %v2265_v20 = vadd.f32 %v2264_v18, %v1875_v12  ;;  %v2306_v21 = vadd.f32 %v2305_v19, %v1883_v0  ;;  %v2392_v22 = vmax.f32 %v2263_v16, 0.0  ;;  %v2394_v23 = vmax.f32 %v2304_v17, 0.0  ;;  %v4087_v16 = vld [vmem:[#allocation13 + $0x2f4] ss:$8 sps:$4 sm:$0xff]  }
 0x338   :  { %v2266_v24 = vpop.f32.mrf.mxu0  ;;  %v2307_v25 = vpop.f32.mrf.mxu1  ;;  %v4090_v17 = vld [vmem:[#allocation13 + $0x3f4] ss:$8 sps:$4 sm:$0xff]  }
 0x339   :  { %v2393_v43 = vmax.f32 %v2265_v20, 0.0  ;;  %v2395_v13 = vmax.f32 %v2306_v21, 0.0  ;;  %v2400_v31 = vpack.c.bf16 %v2392_v22, %v2392_v22  ;;  %v2402_v32 = vpack.c.bf16 %v2394_v23, %v2394_v23  ;;  %v4085_v24 = vld [vmem:[#allocation13 + $0x2f0] ss:$8 sps:$4 sm:$0xff]  }
 0x33a   :  { %v2267_v26 = vpop.f32.mrf.mxu0  ;;  %v2308_v27 = vpop.f32.mrf.mxu1  ;;  %v4088_v25 = vld [vmem:[#allocation13 + $0x3f0] ss:$8 sps:$4 sm:$0xff]  }
 0x33b   :  { %v2401_v28 = vpack.c.bf16 %v2393_v43, %v2393_v43  ;;  %v2403_v29 = vpack.c.bf16 %v2395_v13, %v2395_v13  ;;  %v4093_v43 = vld [vmem:[#allocation13 + $0x2e4] ss:$8 sps:$4 sm:$0xff]   ;;  %v4091_v26 = vld [vmem:[#allocation13 + $0x2e0] ss:$8 sps:$4 sm:$0xff]  }
 0x33c   :  { %v4096_v13 = vld [vmem:[#allocation13 + $0x3e4] ss:$8 sps:$4 sm:$0xff]   ;;  %v4094_v27 = vld [vmem:[#allocation13 + $0x3e0] ss:$8 sps:$4 sm:$0xff]  }
 0x33d   :  { %3220 = vmatprep.mubr.bf16.mxu0 %v2401_v28  ;;  %3261 = vmatprep.mubr.bf16.mxu1 %v2403_v29  ;;  %v4099_v28 = vld [vmem:[#allocation13 + $0x2d4] ss:$8 sps:$4 sm:$0xff]  }
 0x33e   :  { %3221 = vmatmul.mubr.bf16.vlgmr.msra.gmra.mxu0 %v2400_v31  ;;  %3262 = vmatmul.mubr.bf16.vlgmr.msra.gmra.mxu1 %v2402_v32  ;;  %v4102_v29 = vld [vmem:[#allocation13 + $0x3d4] ss:$8 sps:$4 sm:$0xff]   ;;  %v4105_v31 = vld [vmem:[#allocation13 + $0x2c4] ss:$8 sps:$4 sm:$0xff]  }
 0x33f   :  { %3271 = vmatpush1.bf16.msra.mxu0 %v4037_v30  ;;  %3312 = vmatpush1.bf16.msra.mxu1 %v4040_v45  ;;  %v4097_v30 = vld [vmem:[#allocation13 + $0x2d0] ss:$8 sps:$4 sm:$0xff]   ;;  %v4108_v32 = vld [vmem:[#allocation13 + $0x3c4] ss:$8 sps:$4 sm:$0xff]  }
 0x340   :  { %3272 = vmatprep.subr.bf16.mxu0 %v4045_v33  ;;  %3313 = vmatprep.subr.bf16.mxu1 %v4048_v34  ;;  %v4100_v45 = vld [vmem:[#allocation13 + $0x3d0] ss:$8 sps:$4 sm:$0xff]   ;;  %v4103_v33 = vld [vmem:[#allocation13 + $0x2c0] ss:$8 sps:$4 sm:$0xff]  }
 0x341   :  { %v4106_v34 = vld [vmem:[#allocation13 + $0x3c0] ss:$8 sps:$4 sm:$0xff]  }
 0x343   :  { %3273 = vmatpush1.bf16.msra.mxu0 %v4043_v35  ;;  %3314 = vmatpush1.bf16.msra.mxu1 %v4046_v36  ;;  %v4111_v35 = vld [vmem:[#allocation13 + $0x2b4] ss:$8 sps:$4 sm:$0xff]  }
 0x344   :  { %3274 = vmatprep.subr.bf16.mxu0 %v4051_v46  ;;  %3315 = vmatprep.subr.bf16.mxu1 %v4054_v47  ;;  %v4114_v36 = vld [vmem:[#allocation13 + $0x3b4] ss:$8 sps:$4 sm:$0xff]   ;;  %v4109_v46 = vld [vmem:[#allocation13 + $0x2b0] ss:$8 sps:$4 sm:$0xff]  }
 0x345   :  { %v4112_v47 = vld [vmem:[#allocation13 + $0x3b0] ss:$8 sps:$4 sm:$0xff]  }
 0x347   :  { %3275 = vmatpush1.bf16.msra.mxu0 %v4049_v48  ;;  %3316 = vmatpush1.bf16.msra.mxu1 %v4052_v49  ;;  %v4117_v48 = vld [vmem:[#allocation13 + $0x2a4] ss:$8 sps:$4 sm:$0xff]  }
 0x348   :  { %3276 = vmatprep.subr.bf16.mxu0 %v4057_v50  ;;  %3317 = vmatprep.subr.bf16.mxu1 %v4060_v51  ;;  %v4120_v49 = vld [vmem:[#allocation13 + $0x3a4] ss:$8 sps:$4 sm:$0xff]   ;;  %v4115_v50 = vld [vmem:[#allocation13 + $0x2a0] ss:$8 sps:$4 sm:$0xff]  }
 0x349   :  { %v4118_v51 = vld [vmem:[#allocation13 + $0x3a0] ss:$8 sps:$4 sm:$0xff]  }
 0x34b   :  { %3277 = vmatpush1.bf16.msra.mxu0 %v4055_v52  ;;  %3318 = vmatpush1.bf16.msra.mxu1 %v4058_v53  ;;  %v1887_v52 = vrot.slane %v4482_v9, %v278_v37  ;;  %v1895_v53 = vrot.slane %v4482_v9, %v286_v38  ;;  %v4132_v37 = vld [vmem:[#allocation13 + $0x384] ss:$8 sps:$4 sm:$0xff]   ;;  %v4130_v38 = vld [vmem:[#allocation13 + $0x380] ss:$8 sps:$4 sm:$0xff]  }
 0x34c   :  { %3278 = vmatprep.subr.bf16.mxu0 %v4063_v54  ;;  %3319 = vmatprep.subr.bf16.mxu1 %v4066_v55  ;;  %v4123_v54 = vld [vmem:[#allocation13 + $0x294] ss:$8 sps:$4 sm:$0xff]  }
 0x34d   :  { %v4126_v55 = vld [vmem:[#allocation13 + $0x394] ss:$8 sps:$4 sm:$0xff]  }
 0x34f   :  { %3279 = vmatpush1.bf16.msra.mxu0 %v4061_v56  ;;  %3320 = vmatpush1.bf16.msra.mxu1 %v4064_v58  ;;  %v4121_v56 = vld [vmem:[#allocation13 + $0x290] ss:$8 sps:$4 sm:$0xff]  }
 0x350   :  { %3280 = vmatprep.subr.bf16.mxu0 %v4069_v59  ;;  %3321 = vmatprep.subr.bf16.mxu1 %v4072_v60  ;;  %v4124_v58 = vld [vmem:[#allocation13 + $0x390] ss:$8 sps:$4 sm:$0xff]  }
 0x353   :  { %3281 = vmatpush1.bf16.msra.mxu0 %v4067_v61  ;;  %3322 = vmatpush1.bf16.msra.mxu1 %v4070_v62  ;;  %v4129_v61 = vld [vmem:[#allocation13 + $0x284] ss:$8 sps:$4 sm:$0xff]  }
 0x354   :  { %v4500_v6 = vpop.f32.mrf.mxu0  ;;  %v4502_v57 = vpop.f32.mrf.mxu1  ;;  %3282 = vmatprep.subr.bf16.mxu0 %v4075_v63  ;;  %3323 = vmatprep.subr.bf16.mxu1 %v4078_v1 }
 0x355   :  { %v2345_v59 = vadd.f32 %v4500_v6, %v1887_v52  ;;  %v2386_v60 = vadd.f32 %v4502_v57, %v1895_v53 }
 0x356   :  { %v2346_v10 = vpop.f32.mrf.mxu0  ;;  %v2387_v11 = vpop.f32.mrf.mxu1 }
 0x357   :  { %v2347_v12 = vadd.f32 %v2346_v10, %v1891_v2  ;;  %v2388_v0 = vadd.f32 %v2387_v11, %v1899_v3  ;;  %3283 = vmatpush1.bf16.msra.mxu0 %v4073_v4  ;;  %3324 = vmatpush1.bf16.msra.mxu1 %v4076_v5  ;;  %v2396_v9 = vmax.f32 %v2345_v59, 0.0  ;;  %v2398_v62 = vmax.f32 %v2386_v60, 0.0 }
 0x358   :  { %v2348_v15 = vpop.f32.mrf.mxu0  ;;  %v2389_v40 = vpop.f32.mrf.mxu1  ;;  %3284 = vmatprep.subr.bf16.mxu0 %v4081_v7  ;;  %3325 = vmatprep.subr.bf16.mxu1 %v4084_v8 }
 0x359   :  { %v2397_v18 = vmax.f32 %v2347_v12, 0.0  ;;  %v2399_v19 = vmax.f32 %v2388_v0, 0.0  ;;  %v2404_v63 = vpack.c.bf16 %v2396_v9, %v2396_v9  ;;  %v2406_v1 = vpack.c.bf16 %v2398_v62, %v2398_v62 }
 0x35a   :  { %v2349_v20 = vpop.f32.mrf.mxu0  ;;  %v2390_v21 = vpop.f32.mrf.mxu1 }
 0x35b   :  { %v2405_v22 = vpack.c.bf16 %v2397_v18, %v2397_v18  ;;  %v2407_v23 = vpack.c.bf16 %v2399_v19, %v2399_v19  ;;  %3285 = vmatpush1.bf16.msra.mxu0 %v4079_v39  ;;  %3326 = vmatpush1.bf16.msra.mxu1 %v4082_v14 }
 0x35c   :  { %3286 = vmatprep.subr.bf16.mxu0 %v4087_v16  ;;  %3327 = vmatprep.subr.bf16.mxu1 %v4090_v17 }
 0x35d   :  { %3302 = vmatprep.mubr.bf16.mxu0 %v2405_v22  ;;  %3343 = vmatprep.mubr.bf16.mxu1 %v2407_v23 }
 0x35f   :  { %3287 = vmatpush2.bf16.msra.mxu0 %v4085_v24  ;;  %3328 = vmatpush2.bf16.msra.mxu1 %v4088_v25 }
 0x360   :  { %3288 = vmatprep.subr.bf16.mxu0 %v4093_v43  ;;  %3329 = vmatprep.subr.bf16.mxu1 %v4096_v13 }
 0x363   :  { %3289 = vmatpush2.bf16.msra.mxu0 %v4091_v26  ;;  %3330 = vmatpush2.bf16.msra.mxu1 %v4094_v27 }
 0x364   :  { %3290 = vmatprep.subr.bf16.mxu0 %v4099_v28  ;;  %3331 = vmatprep.subr.bf16.mxu1 %v4102_v29 }
 0x367   :  { %3291 = vmatpush2.bf16.msra.mxu0 %v4097_v30  ;;  %3332 = vmatpush2.bf16.msra.mxu1 %v4100_v45 }
 0x368   :  { %3292 = vmatprep.subr.bf16.mxu0 %v4105_v31  ;;  %3333 = vmatprep.subr.bf16.mxu1 %v4108_v32 }
 0x36b   :  { %3293 = vmatpush2.bf16.msra.mxu0 %v4103_v33  ;;  %3334 = vmatpush2.bf16.msra.mxu1 %v4106_v34 }
 0x36c   :  { %3294 = vmatprep.subr.bf16.mxu0 %v4111_v35  ;;  %3335 = vmatprep.subr.bf16.mxu1 %v4114_v36 }
 0x36f   :  { %3295 = vmatpush2.bf16.msra.mxu0 %v4109_v46  ;;  %3336 = vmatpush2.bf16.msra.mxu1 %v4112_v47 }
 0x370   :  { %3296 = vmatprep.subr.bf16.mxu0 %v4117_v48  ;;  %3337 = vmatprep.subr.bf16.mxu1 %v4120_v49 }
 0x373   :  { %3297 = vmatpush2.bf16.msra.mxu0 %v4115_v50  ;;  %3338 = vmatpush2.bf16.msra.mxu1 %v4118_v51 }
 0x374   :  { %3298 = vmatprep.subr.bf16.mxu0 %v4123_v54  ;;  %3339 = vmatprep.subr.bf16.mxu1 %v4126_v55 }
 0x377   :  { %3299 = vmatpush2.bf16.msra.mxu0 %v4121_v56  ;;  %3340 = vmatpush2.bf16.msra.mxu1 %v4124_v58 }
 0x378   :  { %3300 = vmatprep.subr.bf16.mxu0 %v4129_v61  ;;  %3341 = vmatprep.subr.bf16.mxu1 %v4132_v37 }
 0x37b   :  { %3301 = vmatpush2.bf16.msra.mxu0 %v4127_v41  ;;  %3342 = vmatpush2.bf16.msra.mxu1 %v4130_v38 }
 0x37e   :  { %3303 = vmatmul.mubr.bf16.vlgmr.msra.gmra.mxu0 %v2404_v63  ;;  %3344 = vmatmul.mubr.bf16.vlgmr.msra.gmra.mxu1 %v2406_v1 }
 0x37f   :  { %4284 = shalt.err (!%p4281_p11)
}
 0x380   :  { %3375 = dma.vmem_to_hbm [thread:$0]  %s3373_s1, 128, %s4533_s10, [#allocation16]   ;;  %v2536_v10 = vld [vmem:[%s4531_s8] sm:$0x3] }
 0x381   :  { %v2541_v11 = vrot.slane %v2536_v10, %v4438_v42  ;;  %v2545_v12 = vrot.slane %v2536_v10, %v4444_v44  ;;  %s4340_s10 = smov [#allocation14]  }
 0x382   :  { %s3362_s14 = sshll.u32 %s4340_s10, 4  ;;  %s3363_s14 = int_to_ptr.vmem [resolvable:$true] %s3362_s14 }
 0x383   :  { %s4293_s8 = scalar_lea.vmem %s3363_s14, 256  ;;  %p4298_p13 = scmp.lt.s32.totalorder %s3363_s14, %s3363_s14 }
 0x384   :  { %p4294_p12 = scmp.ne.s32.totalorder %s3363_s14, %s4293_s8  ;;  %p4299_p0 = scmp.lt.s32.totalorder %s4293_s8, %s4293_s8 }
 0x386   :  { %p4300_p1 = por %p4299_p0, %p4298_p13 }
 0x388   :  { %p4301_p2 = pnand %p4300_p1, %p4294_p12 }
 0x3fe   :  { %v3222_v2 = vpop.f32.mrf.mxu0  ;;  %v3263_v3 = vpop.f32.mrf.mxu1 }
 0x3ff   :  { %v3223_v0 = vadd.f32 %v3222_v2, %v2541_v11 }
 0x400   :  { %v3224_v4 = vpop.f32.mrf.mxu0  ;;  %v3265_v5 = vpop.f32.mrf.mxu1 }
 0x401   :  { %v3225_v39 = vadd.f32 %v3224_v4, %v2545_v12  ;;  %v3264_v14 = vadd.f32 %v3263_v3, %v3223_v0 }
 0x402   :  { %v3226_v6 = vpop.f32.mrf.mxu0  ;;  %v3267_v57 = vpop.f32.mrf.mxu1 }
 0x403   :  { %v3266_v16 = vadd.f32 %v3265_v5, %v3225_v39 }
 0x404   :  { %v3227_v7 = vpop.f32.mrf.mxu0  ;;  %v3268_v8 = vpop.f32.mrf.mxu1 }
 0x43e   :  { %v3304_v15 = vpop.f32.mrf.mxu0  ;;  %v3345_v40 = vpop.f32.mrf.mxu1 }
 0x43f   :  { %v3305_v17 = vadd.f32 %v3304_v15, %v3264_v14 }
 0x440   :  { %v3306_v18 = vpop.f32.mrf.mxu0  ;;  %v3347_v19 = vpop.f32.mrf.mxu1 }
 0x441   :  { %v3346_v20 = vadd.f32 %v3345_v40, %v3305_v17  ;;  %v3307_v21 = vadd.f32 %v3306_v18, %v3266_v16 }
 0x442   :  { %v3308_v22 = vpop.f32.mrf.mxu0  ;;  %v3349_v23 = vpop.f32.mrf.mxu1 }
 0x443   :  { %v3352_v24 = vmax.f32 %v3346_v20, 0.0  ;;  %v3348_v25 = vadd.f32 %v3347_v19, %v3307_v21 }
 0x444   :  { %v3309_v42 = vpop.f32.mrf.mxu0  ;;  %v3350_v43 = vpop.f32.mrf.mxu1 }
 0x445   :  { %3354 = vst [vmem:[#allocation14] sm:$0xff] %v3352_v24  ;;  %v3353_v44 = vmax.f32 %v3348_v25, 0.0 }
 0x447   :  { %3355 = vst [vmem:[#allocation14 + $0x8] sm:$0xff] %v3353_v44 }
 0x448   :  { %4304 = shalt.err (!%p4301_p2)
}
 0x449   :  { %3365 = dma.vmem_to_hbm [thread:$0]  %s3363_s14, 256, %s4532_s9, [#allocation4]  }
 0x44a   :  { %4321 = dma.done.wait [#allocation4], 256  }
 0x44b   :  { %4322 = vsyncadd [#allocation4], 4294967040 }
 0x44c   :  { %4323 = dma.done.wait [#allocation16], 128  }
 0x44d   :  { %4324 = vsyncadd [#allocation16], 4294967168 }
 0x44e   :  { %3382 = vsyncpa [#allocation3], 1 }
 0x44f   :  { %3383 = vsyncpa [#allocation6], 1 }
 0x450   :  { %3384 = vsyncpa [#allocation9], 1 }
 0x451   :  { %3385 = vsyncpa [#allocation12], 1 }
 0x452   :  { %3386 = vsyncpa [#allocation4], 1 }
 0x453   :  { %3387 = vsyncpa [#allocation16], 1 }

</bundles_post_ra>
